<compile_context>
chip_gen: v6e
topology: v6e:2x2x1
jax: 0.10.0
libtpu: 0.0.40
codegen_flags: <defaults>
</compile_context>

<pallas_src>
import functools

import jax
import jax.numpy as jnp
import numpy as np
from jax.experimental import pallas as pl
from jax.experimental.pallas import tpu as pltpu

NEG_SLOPE = 0.01   # nn.LeakyReLU default
BN_EPS = 1e-5      # nn.BatchNorm2d default


def _leaky(x):
    return jnp.where(x >= 0, x, NEG_SLOPE * x)


# ------------------------- Pallas kernels -------------------------

def _conv_bias_lrelu_kernel(p_ref, w_ref, b_ref, o_ref):
    # im2col matmul + bias + LeakyReLU for one M-tile (grid axis "parallel").
    acc = jnp.dot(p_ref[...], w_ref[...], preferred_element_type=jnp.float32)
    o_ref[...] = _leaky(acc + b_ref[...])


def _conv_bn_lrelu_kernel(p_ref, w_ref, g_ref, b_ref, o_ref):
    # im2col matmul, then train-mode BatchNorm + LeakyReLU over the WHOLE
    # batch.  o_ref is the full [M, C] array (constant index_map), resident in
    # VMEM across the grid: each step writes its raw conv tile, the last step
    # computes global batch stats and normalizes in place.
    i = pl.program_id(0)
    tile_m = p_ref.shape[0]
    acc = jnp.dot(p_ref[...], w_ref[...], preferred_element_type=jnp.float32)
    row0 = pl.multiple_of(i * tile_m, tile_m)
    o_ref[pl.ds(row0, tile_m), :] = acc

    @pl.when(i == pl.num_programs(0) - 1)
    def _():
        x = o_ref[...]
        mean = jnp.mean(x, axis=0, keepdims=True)
        var = jnp.mean(jnp.square(x - mean), axis=0, keepdims=True)
        y = (x - mean) * jax.lax.rsqrt(var + BN_EPS) * g_ref[...] + b_ref[...]
        o_ref[...] = _leaky(y)


def _conv_bn_add_lrelu_kernel(p_ref, w_ref, g_ref, b_ref, res_ref, o_ref):
    # Same as above, plus the ResBlock residual add before the final LeakyReLU.
    i = pl.program_id(0)
    tile_m = p_ref.shape[0]
    acc = jnp.dot(p_ref[...], w_ref[...], preferred_element_type=jnp.float32)
    row0 = pl.multiple_of(i * tile_m, tile_m)
    o_ref[pl.ds(row0, tile_m), :] = acc

    @pl.when(i == pl.num_programs(0) - 1)
    def _():
        x = o_ref[...]
        mean = jnp.mean(x, axis=0, keepdims=True)
        var = jnp.mean(jnp.square(x - mean), axis=0, keepdims=True)
        y = (x - mean) * jax.lax.rsqrt(var + BN_EPS) * g_ref[...] + b_ref[...]
        o_ref[...] = _leaky(y + res_ref[...])


# ------------------------- pallas_call wrappers -------------------------

def _conv1_call(p, w, b, tile_m):
    M, K = p.shape
    C = w.shape[1]
    return pl.pallas_call(
        _conv_bias_lrelu_kernel,
        out_shape=jax.ShapeDtypeStruct((M, C), jnp.float32),
        grid=(M // tile_m,),
        in_specs=[pl.BlockSpec((tile_m, K), lambda i: (i, 0)),   # patches: streamed
                  pl.BlockSpec((K, C), lambda i: (0, 0)),        # weight: resident
                  pl.BlockSpec((1, C), lambda i: (0, 0))],       # bias:   resident
        out_specs=pl.BlockSpec((tile_m, C), lambda i: (i, 0)),
        compiler_params=pltpu.CompilerParams(
            dimension_semantics=("parallel",)),
    )(p, w, b)


def _conv_bn_call(kernel, p, w, g, b, residual, tile_m):
    M, K = p.shape
    C = w.shape[1]
    in_specs = [pl.BlockSpec((tile_m, K), lambda i: (i, 0)),     # patches: streamed
                pl.BlockSpec((K, C), lambda i: (0, 0)),          # weight:  resident
                pl.BlockSpec((1, C), lambda i: (0, 0)),          # gamma
                pl.BlockSpec((1, C), lambda i: (0, 0))]          # beta
    args = [p, w, g, b]
    if residual is not None:
        in_specs.append(pl.BlockSpec((M, C), lambda i: (0, 0)))  # residual: resident
        args.append(residual)
    return pl.pallas_call(
        kernel,
        out_shape=jax.ShapeDtypeStruct((M, C), jnp.float32),
        grid=(M // tile_m,),
        in_specs=in_specs,
        # Constant index_map -> full output stays VMEM-resident (accumulator):
        # BatchNorm needs global stats, so the M axis must be "arbitrary".
        out_specs=pl.BlockSpec((M, C), lambda i: (0, 0)),
        compiler_params=pltpu.CompilerParams(
            dimension_semantics=("arbitrary",)),
    )(*args)


# ------------------------- JAX glue -------------------------

def _round_up(x, m):
    return (x + m - 1) // m * m


def _pick_tile_m(m, requested=None):
    # Rows of the im2col matrix per grid step.  Perf guidance: ~1024 on v7x
    # (64 MiB VMEM), 2048-4096 on v5e/v6e.  Must be a multiple of 8 and divide
    # M (toy shapes here are tiny, so default just picks a divisor <= 1024).
    if requested is not None:
        if m % requested or requested % 8:
            raise ValueError(f"tile_m={requested} must divide M={m} and be a multiple of 8")
        return requested
    t = min(m, 1024)
    t -= t % 8
    while t >= 8 and m % t:
        t -= 8
    return t if t >= 8 else m


def _im2col(x_nhwc, k, stride, pad_mode):
    """[N,H,W,C] -> ([N*Ho*Wo, k*k*C], (N,Ho,Wo)); (dy,dx)-outer / channel-inner."""
    mode = "constant" if pad_mode == "zero" else "reflect"
    xp = jnp.pad(x_nhwc, ((0, 0), (1, 1), (1, 1), (0, 0)), mode=mode)
    N, Hp, Wp, C = xp.shape
    Ho = (Hp - k) // stride + 1
    Wo = (Wp - k) // stride + 1
    patches = []
    for dy in range(k):
        for dx in range(k):
            patches.append(xp[:, dy:dy + stride * (Ho - 1) + 1:stride,
                               dx:dx + stride * (Wo - 1) + 1:stride, :])
    p = jnp.concatenate(patches, axis=-1)            # (N, Ho, Wo, k*k*C)
    return p.reshape(N * Ho * Wo, k * k * C), (N, Ho, Wo)


def _w_to_mat(w):
    # torch conv weight [Cout, Cin, kh, kw] -> im2col matrix [kh*kw*Cin, Cout]
    cout, cin, kh, kw = w.shape
    return jnp.transpose(w, (2, 3, 1, 0)).reshape(kh * kw * cin, cout)


def _spectral_norm_weight(w, u):
    # One power iteration (PyTorch spectral_norm default, training mode).
    eps = 1e-12
    wm = w.reshape(w.shape[0], -1)                   # [Cout, Cin*k*k]
    v = wm.T @ u
    v = v / (jnp.linalg.norm(v) + eps)
    u1 = wm @ v
    u1 = u1 / (jnp.linalg.norm(u1) + eps)
    sigma = jnp.dot(u1, wm @ v)
    return w / sigma


def _prep_matmul_operands(patches, w_mat, k_pad, dtype):
    # Zero-pad the contraction axis to a multiple of 128 (no effect on the
    # result) and cast both MXU operands to the matmul dtype (bf16 by default).
    p = jnp.pad(patches, ((0, 0), (0, k_pad - patches.shape[1])))
    w = jnp.pad(w_mat, ((0, k_pad - w_mat.shape[0]), (0, 0)))
    return p.astype(dtype), w.astype(dtype)


def critic_forward(x_nchw, params, *, tile_m=None, matmul_dtype=jnp.bfloat16):
    x = jnp.transpose(x_nchw, (0, 2, 3, 1)).astype(jnp.float32)   # NHWC
    cout = params["w1"].shape[0]

    # --- spectral_norm(Conv2d(32->64, k=3, s=2, p=1)) + bias + LeakyReLU ---
    w1 = _spectral_norm_weight(params["w1"], params["u1"])
    p0, (N, Ho, Wo) = _im2col(x, 3, 2, "zero")
    M = N * Ho * Wo
    tm = _pick_tile_m(M, tile_m)

    k1p = _round_up(p0.shape[1], 128)                # 9*32 = 288 -> 384
    p0, w1m = _prep_matmul_operands(p0, _w_to_mat(w1), k1p, matmul_dtype)
    y = _conv1_call(p0, w1m, params["b1"].reshape(1, -1).astype(jnp.float32), tm)
    y_img = y.reshape(N, Ho, Wo, cout)               # f32 activations

    # --- ResBlock: conv -> BN -> LeakyReLU (one fused call) ---
    p1, _ = _im2col(y_img, 3, 1, "reflect")
    k2p = _round_up(p1.shape[1], 128)                # 9*64 = 576 -> 640
    p1, rw1 = _prep_matmul_operands(p1, _w_to_mat(params["rw1"]), k2p, matmul_dtype)
    h = _conv_bn_call(_conv_bn_lrelu_kernel, p1, rw1,
                      params["g1"].reshape(1, -1).astype(jnp.float32),
                      params["be1"].reshape(1, -1).astype(jnp.float32),
                      None, tm)

    # --- ResBlock: conv -> BN -> (+ residual) -> LeakyReLU (one fused call) ---
    p2, _ = _im2col(h.reshape(N, Ho, Wo, cout), 3, 1, "reflect")
    p2, rw2 = _prep_matmul_operands(p2, _w_to_mat(params["rw2"]), k2p, matmul_dtype)
    out = _conv_bn_call(_conv_bn_add_lrelu_kernel, p2, rw2,
                        params["g2"].reshape(1, -1).astype(jnp.float32),
                        params["be2"].reshape(1, -1).astype(jnp.float32),
                        y, tm)

    return jnp.transpose(out.reshape(N, Ho, Wo, cout), (0, 3, 1, 2))  # NCHW


# ------------------------- pure-JAX reference -------------------------

def _ref_forward(x, params, matmul_dtype=None):
    """XLA reference.  matmul_dtype=None -> all-f32 (HIGHEST precision);
    otherwise conv operands are cast to matmul_dtype with f32 accumulation,
    mirroring the Pallas kernels' MXU dtype."""
    prec = jax.lax.Precision.HIGHEST

    def conv(a, w, stride, pad):
        if matmul_dtype is not None:
            a = a.astype(matmul_dtype)
            w = w.astype(matmul_dtype)
        return jax.lax.conv_general_dilated(
            a, w, window_strides=(stride, stride), padding=pad,
            dimension_numbers=("NCHW", "OIHW", "NCHW"),
            precision=prec, preferred_element_type=jnp.float32)

    def bn(a, g, b):
        mean = jnp.mean(a, axis=(0, 2, 3), keepdims=True)
        var = jnp.mean(jnp.square(a - mean), axis=(0, 2, 3), keepdims=True)
        return ((a - mean) * jax.lax.rsqrt(var + BN_EPS)
                * g.reshape(1, -1, 1, 1) + b.reshape(1, -1, 1, 1))

    w1 = _spectral_norm_weight(params["w1"], params["u1"])
    y = conv(x, w1, 2, ((1, 1), (1, 1))) + params["b1"].reshape(1, -1, 1, 1)
    y = _leaky(y)
    yr = jnp.pad(y, ((0, 0), (0, 0), (1, 1), (1, 1)), mode="reflect")
    h = _leaky(bn(conv(yr, params["rw1"], 1, "VALID"), params["g1"], params["be1"]))
    hr = jnp.pad(h, ((0, 0), (0, 0), (1, 1), (1, 1)), mode="reflect")
    h2 = bn(conv(hr, params["rw2"], 1, "VALID"), params["g2"], params["be2"])
    return _leaky(h2 + y)


# ------------------------- main -------------------------

if __name__ == "__main__":
    key = jax.random.PRNGKey(0)
    keys = jax.random.split(key, 6)
    N, Cin, H, W = 2, 32, 16, 16
    Cout = 64  # Critic(inchan=32, times=1): one stride-2 conv to 64 channels

    x = jax.random.normal(keys[0], (N, Cin, H, W), jnp.float32)
    params = dict(
        w1=jax.random.normal(keys[1], (Cout, Cin, 3, 3), jnp.float32) * 0.05,
        b1=jax.random.normal(keys[2], (Cout,), jnp.float32) * 0.05,
        u1=jax.random.normal(keys[3], (Cout,), jnp.float32),   # spectral-norm u
        rw1=jax.random.normal(keys[4], (Cout, Cout, 3, 3), jnp.float32) * 0.05,
        rw2=jax.random.normal(keys[5], (Cout, Cout, 3, 3), jnp.float32) * 0.05,
        g1=jnp.ones((Cout,), jnp.float32), be1=jnp.zeros((Cout,), jnp.float32),
        g2=jnp.ones((Cout,), jnp.float32), be2=jnp.zeros((Cout,), jnp.float32),
    )

    forward = jax.jit(critic_forward, static_argnames=("tile_m", "matmul_dtype"))

    # tile_m=64 -> grid of 2 M-tiles even at this toy size, so the streamed
    # patch / resident weight / cross-tile BatchNorm path is exercised.
    out = jax.block_until_ready(forward(x, params, tile_m=64,
                                        matmul_dtype=jnp.bfloat16))
    assert out.shape == (N, Cout, H // 2, W // 2), out.shape

    # 1) Implementation check against an XLA reference that uses the same
    #    bf16 MXU operands (tight tolerance isolates kernel-structure bugs).
    ref_bf16 = jax.block_until_ready(
        jax.jit(_ref_forward, static_argnames=("matmul_dtype",))(
            x, params, matmul_dtype=jnp.bfloat16))
    np.testing.assert_allclose(np.asarray(out), np.asarray(ref_bf16),
                               rtol=1e-3, atol=1e-3)

    # 2) Numerics sanity band vs the all-f32 reference (bf16 MXU inputs).
    ref_f32 = jax.block_until_ready(jax.jit(_ref_forward)(x, params))
    np.testing.assert_allclose(np.asarray(out), np.asarray(ref_f32),
                               rtol=5e-2, atol=5e-2)

    print("KERNEL_OK")
</pallas_src>

<mosaic_0001>
module attributes {stable_mosaic.version = 11 : i64} {
  func.func @_conv_bias_lrelu_kernel(%arg0: i32, %arg1: memref<64x384xbf16, #tpu.memory_space<vmem>>, %arg2: memref<384x64xbf16, #tpu.memory_space<vmem>>, %arg3: memref<1x64xf32, #tpu.memory_space<vmem>>, %arg4: memref<64x64xf32, #tpu.memory_space<vmem>>) attributes {dimension_semantics = [#tpu.dimension_semantics<parallel>], iteration_bounds = array<i64: 2>, scalar_prefetch = 0 : i64, scratch_operands = 0 : i64, tpu.core_type = #tpu.core_type<tc>, window_params = [{transform_indices = @transform_0, window_bounds = array<i64: 64, 384>}, {pipeline_mode = #tpu.pipeline_mode<synchronous>, transform_indices = @transform_1, window_bounds = array<i64: 384, 64>}, {pipeline_mode = #tpu.pipeline_mode<synchronous>, transform_indices = @transform_2, window_bounds = array<i64: 1, 64>}, {transform_indices = @transform_3, window_bounds = array<i64: 64, 64>}]} {
    %c0 = arith.constant 0 : index
    %c0_0 = arith.constant 0 : index
    %0 = vector.load %arg1[%c0, %c0_0] : memref<64x384xbf16, #tpu.memory_space<vmem>>, vector<64x384xbf16>
    %c0_1 = arith.constant 0 : index
    %c0_2 = arith.constant 0 : index
    %1 = vector.load %arg2[%c0_1, %c0_2] : memref<384x64xbf16, #tpu.memory_space<vmem>>, vector<384x64xbf16>
    %cst = arith.constant dense<0.000000e+00> : vector<64x64xf32>
    %2 = tpu.matmul %0, %1, %cst {dimension_numbers = #tpu.dot_dimension_numbers<[1], [0], [0], [1], [0, 0, 1, 1], [], []>} : vector<64x384xbf16>, vector<384x64xbf16>, vector<64x64xf32> -> vector<64x64xf32>
    %c0_3 = arith.constant 0 : index
    %c0_4 = arith.constant 0 : index
    %3 = vector.load %arg3[%c0_3, %c0_4] : memref<1x64xf32, #tpu.memory_space<vmem>>, vector<1x64xf32>
    %4 = vector.broadcast %3 : vector<1x64xf32> to vector<64x64xf32>
    %5 = arith.addf %2, %4 : vector<64x64xf32>
    %cst_5 = arith.constant 0.000000e+00 : f32
    %6 = vector.broadcast %cst_5 : f32 to vector<64x64xf32>
    %7 = arith.cmpf oge, %5, %6 : vector<64x64xf32>
    %cst_6 = arith.constant 0.00999999977 : f32
    %8 = vector.broadcast %cst_6 : f32 to vector<64x64xf32>
    %9 = arith.mulf %8, %5 : vector<64x64xf32>
    %10 = arith.select %7, %5, %9 : vector<64x64xi1>, vector<64x64xf32>
    %c0_7 = arith.constant 0 : index
    %c0_8 = arith.constant 0 : index
    %11 = vector.load %arg4[%c0_7, %c0_8] : memref<64x64xf32, #tpu.memory_space<vmem>>, vector<64x64xf32>
    tpu.vector_store %arg4[%c0_7, %c0_8], %10 {strides = array<i32>} : memref<64x64xf32, #tpu.memory_space<vmem>>, vector<64x64xf32>,
    return
  }
  func.func @transform_0(%arg0: i32) -> (i32, i32) {
    %c0_i32 = arith.constant 0 : i32
    %c0_i32_0 = arith.constant 0 : i32
    return %arg0, %c0_i32 : i32, i32
  }
  func.func @transform_1(%arg0: i32) -> (i32, i32) {
    %c0_i32 = arith.constant 0 : i32
    %c0_i32_0 = arith.constant 0 : i32
    %c0_i32_1 = arith.constant 0 : i32
    return %c0_i32, %c0_i32_0 : i32, i32
  }
  func.func @transform_2(%arg0: i32) -> (i32, i32) {
    %c0_i32 = arith.constant 0 : i32
    %c0_i32_0 = arith.constant 0 : i32
    %c0_i32_1 = arith.constant 0 : i32
    return %c0_i32, %c0_i32_0 : i32, i32
  }
  func.func @transform_3(%arg0: i32) -> (i32, i32) {
    %c0_i32 = arith.constant 0 : i32
    %c0_i32_0 = arith.constant 0 : i32
    return %arg0, %c0_i32 : i32, i32
  }
}

module attributes {stable_mosaic.version = 11 : i64} {
  func.func @_conv_bn_lrelu_kernel(%arg0: i32, %arg1: memref<64x640xbf16, #tpu.memory_space<vmem>>, %arg2: memref<640x64xbf16, #tpu.memory_space<vmem>>, %arg3: memref<1x64xf32, #tpu.memory_space<vmem>>, %arg4: memref<1x64xf32, #tpu.memory_space<vmem>>, %arg5: memref<128x64xf32, #tpu.memory_space<vmem>>) attributes {dimension_semantics = [#tpu.dimension_semantics<arbitrary>], iteration_bounds = array<i64: 2>, scalar_prefetch = 0 : i64, scratch_operands = 0 : i64, tpu.core_type = #tpu.core_type<tc>, window_params = [{transform_indices = @transform_0, window_bounds = array<i64: 64, 640>}, {pipeline_mode = #tpu.pipeline_mode<synchronous>, transform_indices = @transform_1, window_bounds = array<i64: 640, 64>}, {pipeline_mode = #tpu.pipeline_mode<synchronous>, transform_indices = @transform_2, window_bounds = array<i64: 1, 64>}, {pipeline_mode = #tpu.pipeline_mode<synchronous>, transform_indices = @transform_3, window_bounds = array<i64: 1, 64>}, {pipeline_mode = #tpu.pipeline_mode<synchronous>, transform_indices = @transform_4, window_bounds = array<i64: 128, 64>}]} {
    %c0 = arith.constant 0 : index
    %c0_0 = arith.constant 0 : index
    %0 = vector.load %arg1[%c0, %c0_0] : memref<64x640xbf16, #tpu.memory_space<vmem>>, vector<64x640xbf16>
    %c0_1 = arith.constant 0 : index
    %c0_2 = arith.constant 0 : index
    %1 = vector.load %arg2[%c0_1, %c0_2] : memref<640x64xbf16, #tpu.memory_space<vmem>>, vector<640x64xbf16>
    %cst = arith.constant dense<0.000000e+00> : vector<64x64xf32>
    %2 = tpu.matmul %0, %1, %cst {dimension_numbers = #tpu.dot_dimension_numbers<[1], [0], [0], [1], [0, 0, 1, 1], [], []>} : vector<64x640xbf16>, vector<640x64xbf16>, vector<64x64xf32> -> vector<64x64xf32>
    %c64_i32 = arith.constant 64 : i32
    %3 = arith.muli %arg0, %c64_i32 : i32
    %4 = tpu.assume_multiple %3, 64 : i32
    %5 = arith.index_cast %4 : i32 to index
    %c0_3 = arith.constant 0 : index
    %6 = vector.load %arg5[%5, %c0_3] : memref<128x64xf32, #tpu.memory_space<vmem>>, vector<64x64xf32>
    tpu.vector_store %arg5[%5, %c0_3], %2 {strides = array<i32>} : memref<128x64xf32, #tpu.memory_space<vmem>>, vector<64x64xf32>,
    %c1_i32 = arith.constant 1 : i32
    %7 = arith.cmpi eq, %arg0, %c1_i32 : i32
    %8 = arith.extui %7 : i1 to i32
    %c0_i32 = arith.constant 0 : i32
    %9 = arith.cmpi ne, %8, %c0_i32 : i32
    scf.if %9 {
      %c0_4 = arith.constant 0 : index
      %c0_5 = arith.constant 0 : index
      %10 = vector.load %arg5[%c0_4, %c0_5] : memref<128x64xf32, #tpu.memory_space<vmem>>, vector<128x64xf32>
      %cst_6 = arith.constant dense<0.000000e+00> : vector<64xf32>
      %11 = vector.multi_reduction <add>, %10, %cst_6 [0] : vector<128x64xf32> to vector<64xf32>
      %12 = vector.shape_cast %11 : vector<64xf32> to vector<1x64xf32>
      %cst_7 = arith.constant 1.280000e+02 : f32
      %13 = vector.broadcast %cst_7 : f32 to vector<1x64xf32>
      %14 = arith.divf %12, %13 : vector<1x64xf32>
      %15 = vector.broadcast %14 : vector<1x64xf32> to vector<128x64xf32>
      %16 = arith.subf %10, %15 : vector<128x64xf32>
      %17 = arith.mulf %16, %16 : vector<128x64xf32>
      %cst_8 = arith.constant dense<0.000000e+00> : vector<64xf32>
      %18 = vector.multi_reduction <add>, %17, %cst_8 [0] : vector<128x64xf32> to vector<64xf32>
      %19 = vector.shape_cast %18 : vector<64xf32> to vector<1x64xf32>
      %cst_9 = arith.constant 1.280000e+02 : f32
      %20 = vector.broadcast %cst_9 : f32 to vector<1x64xf32>
      %21 = arith.divf %19, %20 : vector<1x64xf32>
      %22 = vector.broadcast %14 : vector<1x64xf32> to vector<128x64xf32>
      %23 = arith.subf %10, %22 : vector<128x64xf32>
      %cst_10 = arith.constant 9.99999974E-6 : f32
      %24 = vector.broadcast %cst_10 : f32 to vector<1x64xf32>
      %25 = arith.addf %21, %24 : vector<1x64xf32>
      %26 = math.rsqrt %25 : vector<1x64xf32>
      %27 = vector.broadcast %26 : vector<1x64xf32> to vector<128x64xf32>
      %28 = arith.mulf %23, %27 : vector<128x64xf32>
      %c0_11 = arith.constant 0 : index
      %c0_12 = arith.constant 0 : index
      %29 = vector.load %arg3[%c0_11, %c0_12] : memref<1x64xf32, #tpu.memory_space<vmem>>, vector<1x64xf32>
      %30 = vector.broadcast %29 : vector<1x64xf32> to vector<128x64xf32>
      %31 = arith.mulf %28, %30 : vector<128x64xf32>
      %c0_13 = arith.constant 0 : index
      %c0_14 = arith.constant 0 : index
      %32 = vector.load %arg4[%c0_13, %c0_14] : memref<1x64xf32, #tpu.memory_space<vmem>>, vector<1x64xf32>
      %33 = vector.broadcast %32 : vector<1x64xf32> to vector<128x64xf32>
      %34 = arith.addf %31, %33 : vector<128x64xf32>
      %cst_15 = arith.constant 0.000000e+00 : f32
      %35 = vector.broadcast %cst_15 : f32 to vector<128x64xf32>
      %36 = arith.cmpf oge, %34, %35 : vector<128x64xf32>
      %cst_16 = arith.constant 0.00999999977 : f32
      %37 = vector.broadcast %cst_16 : f32 to vector<128x64xf32>
      %38 = arith.mulf %37, %34 : vector<128x64xf32>
      %39 = arith.select %36, %34, %38 : vector<128x64xi1>, vector<128x64xf32>
      %c0_17 = arith.constant 0 : index
      %c0_18 = arith.constant 0 : index
      %40 = vector.load %arg5[%c0_17, %c0_18] : memref<128x64xf32, #tpu.memory_space<vmem>>, vector<128x64xf32>
      tpu.vector_store %arg5[%c0_17, %c0_18], %39 {strides = array<i32>} : memref<128x64xf32, #tpu.memory_space<vmem>>, vector<128x64xf32>,
    } else {
    }
    return
  }
  func.func @transform_0(%arg0: i32) -> (i32, i32) {
    %c0_i32 = arith.constant 0 : i32
    %c0_i32_0 = arith.constant 0 : i32
    return %arg0, %c0_i32 : i32, i32
  }
  func.func @transform_1(%arg0: i32) -> (i32, i32) {
    %c0_i32 = arith.constant 0 : i32
    %c0_i32_0 = arith.constant 0 : i32
    %c0_i32_1 = arith.constant 0 : i32
    return %c0_i32, %c0_i32_0 : i32, i32
  }
  func.func @transform_2(%arg0: i32) -> (i32, i32) {
    %c0_i32 = arith.constant 0 : i32
    %c0_i32_0 = arith.constant 0 : i32
    %c0_i32_1 = arith.constant 0 : i32
    return %c0_i32, %c0_i32_0 : i32, i32
  }
  func.func @transform_3(%arg0: i32) -> (i32, i32) {
    %c0_i32 = arith.constant 0 : i32
    %c0_i32_0 = arith.constant 0 : i32
    %c0_i32_1 = arith.constant 0 : i32
    return %c0_i32, %c0_i32_0 : i32, i32
  }
  func.func @transform_4(%arg0: i32) -> (i32, i32) {
    %c0_i32 = arith.constant 0 : i32
    %c0_i32_0 = arith.constant 0 : i32
    %c0_i32_1 = arith.constant 0 : i32
    return %c0_i32, %c0_i32_0 : i32, i32
  }
}

module attributes {stable_mosaic.version = 11 : i64} {
  func.func @_conv_bn_add_lrelu_kernel(%arg0: i32, %arg1: memref<64x640xbf16, #tpu.memory_space<vmem>>, %arg2: memref<640x64xbf16, #tpu.memory_space<vmem>>, %arg3: memref<1x64xf32, #tpu.memory_space<vmem>>, %arg4: memref<1x64xf32, #tpu.memory_space<vmem>>, %arg5: memref<128x64xf32, #tpu.memory_space<vmem>>, %arg6: memref<128x64xf32, #tpu.memory_space<vmem>>) attributes {dimension_semantics = [#tpu.dimension_semantics<arbitrary>], iteration_bounds = array<i64: 2>, scalar_prefetch = 0 : i64, scratch_operands = 0 : i64, tpu.core_type = #tpu.core_type<tc>, window_params = [{transform_indices = @transform_0, window_bounds = array<i64: 64, 640>}, {pipeline_mode = #tpu.pipeline_mode<synchronous>, transform_indices = @transform_1, window_bounds = array<i64: 640, 64>}, {pipeline_mode = #tpu.pipeline_mode<synchronous>, transform_indices = @transform_2, window_bounds = array<i64: 1, 64>}, {pipeline_mode = #tpu.pipeline_mode<synchronous>, transform_indices = @transform_3, window_bounds = array<i64: 1, 64>}, {pipeline_mode = #tpu.pipeline_mode<synchronous>, transform_indices = @transform_4, window_bounds = array<i64: 128, 64>}, {pipeline_mode = #tpu.pipeline_mode<synchronous>, transform_indices = @transform_5, window_bounds = array<i64: 128, 64>}]} {
    %c0 = arith.constant 0 : index
    %c0_0 = arith.constant 0 : index
    %0 = vector.load %arg1[%c0, %c0_0] : memref<64x640xbf16, #tpu.memory_space<vmem>>, vector<64x640xbf16>
    %c0_1 = arith.constant 0 : index
    %c0_2 = arith.constant 0 : index
    %1 = vector.load %arg2[%c0_1, %c0_2] : memref<640x64xbf16, #tpu.memory_space<vmem>>, vector<640x64xbf16>
    %cst = arith.constant dense<0.000000e+00> : vector<64x64xf32>
    %2 = tpu.matmul %0, %1, %cst {dimension_numbers = #tpu.dot_dimension_numbers<[1], [0], [0], [1], [0, 0, 1, 1], [], []>} : vector<64x640xbf16>, vector<640x64xbf16>, vector<64x64xf32> -> vector<64x64xf32>
    %c64_i32 = arith.constant 64 : i32
    %3 = arith.muli %arg0, %c64_i32 : i32
    %4 = tpu.assume_multiple %3, 64 : i32
    %5 = arith.index_cast %4 : i32 to index
    %c0_3 = arith.constant 0 : index
    %6 = vector.load %arg6[%5, %c0_3] : memref<128x64xf32, #tpu.memory_space<vmem>>, vector<64x64xf32>
    tpu.vector_store %arg6[%5, %c0_3], %2 {strides = array<i32>} : memref<128x64xf32, #tpu.memory_space<vmem>>, vector<64x64xf32>,
    %c1_i32 = arith.constant 1 : i32
    %7 = arith.cmpi eq, %arg0, %c1_i32 : i32
    %8 = arith.extui %7 : i1 to i32
    %c0_i32 = arith.constant 0 : i32
    %9 = arith.cmpi ne, %8, %c0_i32 : i32
    scf.if %9 {
      %c0_4 = arith.constant 0 : index
      %c0_5 = arith.constant 0 : index
      %10 = vector.load %arg6[%c0_4, %c0_5] : memref<128x64xf32, #tpu.memory_space<vmem>>, vector<128x64xf32>
      %cst_6 = arith.constant dense<0.000000e+00> : vector<64xf32>
      %11 = vector.multi_reduction <add>, %10, %cst_6 [0] : vector<128x64xf32> to vector<64xf32>
      %12 = vector.shape_cast %11 : vector<64xf32> to vector<1x64xf32>
      %cst_7 = arith.constant 1.280000e+02 : f32
      %13 = vector.broadcast %cst_7 : f32 to vector<1x64xf32>
      %14 = arith.divf %12, %13 : vector<1x64xf32>
      %15 = vector.broadcast %14 : vector<1x64xf32> to vector<128x64xf32>
      %16 = arith.subf %10, %15 : vector<128x64xf32>
      %17 = arith.mulf %16, %16 : vector<128x64xf32>
      %cst_8 = arith.constant dense<0.000000e+00> : vector<64xf32>
      %18 = vector.multi_reduction <add>, %17, %cst_8 [0] : vector<128x64xf32> to vector<64xf32>
      %19 = vector.shape_cast %18 : vector<64xf32> to vector<1x64xf32>
      %cst_9 = arith.constant 1.280000e+02 : f32
      %20 = vector.broadcast %cst_9 : f32 to vector<1x64xf32>
      %21 = arith.divf %19, %20 : vector<1x64xf32>
      %22 = vector.broadcast %14 : vector<1x64xf32> to vector<128x64xf32>
      %23 = arith.subf %10, %22 : vector<128x64xf32>
      %cst_10 = arith.constant 9.99999974E-6 : f32
      %24 = vector.broadcast %cst_10 : f32 to vector<1x64xf32>
      %25 = arith.addf %21, %24 : vector<1x64xf32>
      %26 = math.rsqrt %25 : vector<1x64xf32>
      %27 = vector.broadcast %26 : vector<1x64xf32> to vector<128x64xf32>
      %28 = arith.mulf %23, %27 : vector<128x64xf32>
      %c0_11 = arith.constant 0 : index
      %c0_12 = arith.constant 0 : index
      %29 = vector.load %arg3[%c0_11, %c0_12] : memref<1x64xf32, #tpu.memory_space<vmem>>, vector<1x64xf32>
      %30 = vector.broadcast %29 : vector<1x64xf32> to vector<128x64xf32>
      %31 = arith.mulf %28, %30 : vector<128x64xf32>
      %c0_13 = arith.constant 0 : index
      %c0_14 = arith.constant 0 : index
      %32 = vector.load %arg4[%c0_13, %c0_14] : memref<1x64xf32, #tpu.memory_space<vmem>>, vector<1x64xf32>
      %33 = vector.broadcast %32 : vector<1x64xf32> to vector<128x64xf32>
      %34 = arith.addf %31, %33 : vector<128x64xf32>
      %c0_15 = arith.constant 0 : index
      %c0_16 = arith.constant 0 : index
      %35 = vector.load %arg5[%c0_15, %c0_16] : memref<128x64xf32, #tpu.memory_space<vmem>>, vector<128x64xf32>
      %36 = arith.addf %34, %35 : vector<128x64xf32>
      %cst_17 = arith.constant 0.000000e+00 : f32
      %37 = vector.broadcast %cst_17 : f32 to vector<128x64xf32>
      %38 = arith.cmpf oge, %36, %37 : vector<128x64xf32>
      %cst_18 = arith.constant 0.00999999977 : f32
      %39 = vector.broadcast %cst_18 : f32 to vector<128x64xf32>
      %40 = arith.mulf %39, %36 : vector<128x64xf32>
      %41 = arith.select %38, %36, %40 : vector<128x64xi1>, vector<128x64xf32>
      %c0_19 = arith.constant 0 : index
      %c0_20 = arith.constant 0 : index
      %42 = vector.load %arg6[%c0_19, %c0_20] : memref<128x64xf32, #tpu.memory_space<vmem>>, vector<128x64xf32>
      tpu.vector_store %arg6[%c0_19, %c0_20], %41 {strides = array<i32>} : memref<128x64xf32, #tpu.memory_space<vmem>>, vector<128x64xf32>,
    } else {
    }
    return
  }
  func.func @transform_0(%arg0: i32) -> (i32, i32) {
    %c0_i32 = arith.constant 0 : i32
    %c0_i32_0 = arith.constant 0 : i32
    return %arg0, %c0_i32 : i32, i32
  }
  func.func @transform_1(%arg0: i32) -> (i32, i32) {
    %c0_i32 = arith.constant 0 : i32
    %c0_i32_0 = arith.constant 0 : i32
    %c0_i32_1 = arith.constant 0 : i32
    return %c0_i32, %c0_i32_0 : i32, i32
  }
  func.func @transform_2(%arg0: i32) -> (i32, i32) {
    %c0_i32 = arith.constant 0 : i32
    %c0_i32_0 = arith.constant 0 : i32
    %c0_i32_1 = arith.constant 0 : i32
    return %c0_i32, %c0_i32_0 : i32, i32
  }
  func.func @transform_3(%arg0: i32) -> (i32, i32) {
    %c0_i32 = arith.constant 0 : i32
    %c0_i32_0 = arith.constant 0 : i32
    %c0_i32_1 = arith.constant 0 : i32
    return %c0_i32, %c0_i32_0 : i32, i32
  }
  func.func @transform_4(%arg0: i32) -> (i32, i32) {
    %c0_i32 = arith.constant 0 : i32
    %c0_i32_0 = arith.constant 0 : i32
    %c0_i32_1 = arith.constant 0 : i32
    return %c0_i32, %c0_i32_0 : i32, i32
  }
  func.func @transform_5(%arg0: i32) -> (i32, i32) {
    %c0_i32 = arith.constant 0 : i32
    %c0_i32_0 = arith.constant 0 : i32
    %c0_i32_1 = arith.constant 0 : i32
    return %c0_i32, %c0_i32_0 : i32, i32
  }
}

</mosaic_0001>

<bundles_post_ra>
// kernel: critic_forward.3
= control target key start
LH: loop header
LB: loop body
LE: loop exit
PB: predicated region body
PF: predicated region fallthrough
CT: control target
= control target key end

     0   :  { %s877_s12 = smov 0   ;;  %s1015_s0 = inlined_call_operand.vmem [shape: bf16[128,384], index: 0, kind: input, shape index: {}]   ;;  %s1016_s1 = inlined_call_operand.vmem [shape: bf16[384,64], index: 1, kind: input, shape index: {}]   ;;  %s1017_s2 = inlined_call_operand.vmem [shape: f32[1,64], index: 2, kind: input, shape index: {}]   ;;  %s1018_s3 = inlined_call_operand.vmem [shape: f32[128,64], index: 3, kind: output, shape index: {}]  }
   0x1 LB: > { %s676_s13 = sadd.s32 4294967295, %s855_s12   ;;  %p680_p0 = scmp.ge.s32.totalorder %s855_s12, 1  ;;  %s855_s12 = sphi %s877_s12, %s13_s12  }
   0x2   : > { %p139_p1 = scmp.lt.s32.totalorder %s855_s12, 3 }
   0x4   : > { %p140_p2 = pnand %p680_p0, %p139_p1 }
   0x5   : > { %s681_s28 = sshll.u32 (!%p140_p2), %s676_s13, 3 }
   0x6   : > { %143 = sbr.rel (%p140_p2) target bundleno = 277 (0x115), region = 32  ;;  %p165_p3 = scmp.lt.s32.totalorder (!%p140_p2), %s681_s28, 15 }
   0xb   : > { %v809_v0 = vld [vmem:[%s1016_s1 + $0x78] sm:$0xff]   ;;  %v811_v2 = vld [vmem:[%s1016_s1 + $0x70] sm:$0xff]   ;;  %v814_v5 = vld [vmem:[%s1016_s1 + $0x68] sm:$0xff]   ;;  %s1020_s28 = smov (!%p165_p3, %s681_s28), 15  ;;  %vm611_vm1 = vcmask 523264  }
   0xc   : > { %v810_v1 = vld [vmem:[%s1016_s1 + $0x38] sm:$0xff]   ;;  %724 = vmatprep.subr.bf16.mxu0 %v809_v0  ;;  %v813_v4 = vld [vmem:[%s1016_s1 + $0x30] sm:$0xff]   ;;  %v816_v7 = vld [vmem:[%s1016_s1 + $0x28] sm:$0xff]   ;;  %s800_s21 = smul.u32 12, %s1020_s28  ;;  %s684_s18 = sshll.u32 %s1020_s28, 3 }
   0xd   : > { %725 = vmatpush3.bf16.msra.mxu0 %v810_v1  ;;  %v812_v3 = vld [vmem:[%s1016_s1 + $0xb8] sm:$0xff]   ;;  %v815_v6 = vld [vmem:[%s1016_s1 + $0xb0] sm:$0xff]   ;;  %v817_v8 = vld [vmem:[%s1016_s1 + $0x60] sm:$0xff]  }
   0xe   : > { %726 = vmatprep.subr.bf16.mxu0 %v811_v2  ;;  %776 = vmatprep.subr.bf16.mxu1 %v812_v3  ;;  %v818_v9 = vld [vmem:[%s1016_s1 + $0xa8] sm:$0xff]   ;;  %v819_v10 = vld [vmem:[%s1016_s1 + $0x20] sm:$0xff]   ;;  %v820_v11 = vld [vmem:[%s1016_s1 + $0x58] sm:$0xff]   ;;  %s951_s6 = scalar_lea.vmem %s1015_s0, %s800_s21  ;;  %s987_s21 = scalar_lea.vmem %s1018_s3, %s684_s18 }
   0xf   : > { %777 = vmatpush3.bf16.msra.mxu1 %v812_v3  ;;  %v821_v12 = vld [vmem:[%s1016_s1 + $0xa0] sm:$0xff]   ;;  %v822_v13 = vld [vmem:[%s1016_s1 + $0x18] sm:$0xff]   ;;  %v823_v15 = vld [vmem:[%s1016_s1 + $0x50] sm:$0xff]  }
  0x10   : > { %778 = vmatprep.subr.bf16.mxu1 %v815_v6  ;;  %v824_v14 = vld [vmem:[%s1016_s1 + $0x98] sm:$0xff]   ;;  %v825_v16 = vld [vmem:[%s1016_s1 + $0x10] sm:$0xff]   ;;  %v826_v18 = vld [vmem:[%s1016_s1 + $0x48] sm:$0xff]  }
  0x11   : > { %727 = vmatpush3.bf16.msra.mxu0 %v813_v4  ;;  %v827_v17 = vld [vmem:[%s1016_s1 + $0x90] sm:$0xff]   ;;  %v828_v19 = vld [vmem:[%s1016_s1 + $0x8] sm:$0xff]   ;;  %v829_v20 = vld [vmem:[%s1016_s1 + $0x40] sm:$0xff]  }
  0x12   : > { %728 = vmatprep.subr.bf16.mxu0 %v814_v5  ;;  %v830_v21 = vld [vmem:[%s1016_s1 + $0x88] sm:$0xff]   ;;  %v834_v22 = vld [vmem:[%s951_s6 + $0x4] ss:$12 sps:$4 sm:$0xff]   ;;  %v841_v31 = vld [vmem:[%s951_s6 + $0x34] ss:$12 sps:$4 sm:$0xff]  }
  0x13   : > { %779 = vmatpush3.bf16.msra.mxu1 %v815_v6  ;;  %v831_v23 = vld [vmem:[%s1016_s1] sm:$0xff]   ;;  %489 = vmatprep.mubr.bf16.mxu0 %v834_v22  ;;  %v836_v24 = vld [vmem:[%s951_s6 + $0x8] ss:$12 sps:$4 sm:$0xff]   ;;  %v845_v32 = vld [vmem:[%s951_s6 + $0x50] ss:$12 sps:$4 sm:$0xff]  }
  0x14   : > { %780 = vmatprep.subr.bf16.mxu1 %v818_v9  ;;  %v835_v25 = vld [vmem:[%s1016_s1 + $0x80] sm:$0xff]   ;;  %792 = vmatprep.mubr.bf16.mxu1 %v836_v24  ;;  %v838_v27 = vld [vmem:[%s951_s6 + $0x1c] ss:$12 sps:$4 sm:$0xff]   ;;  %v846_v34 = vld [vmem:[%s951_s6 + $0x4c] ss:$12 sps:$4 sm:$0xff]  }
  0x15   : > { %729 = vmatpush3.bf16.msra.mxu0 %v816_v7  ;;  %v832_v26 = vld [vmem:[%s951_s6] ss:$12 sps:$4 sm:$0xff]   ;;  %v844_v29 = vld [vmem:[%s951_s6 + $0x38] ss:$12 sps:$4 sm:$0xff]   ;;  %v843_v33 = vld [vmem:[%s951_s6 + $0x30] ss:$12 sps:$4 sm:$0xff]  }
  0x16   : > { %730 = vmatprep.subr.bf16.mxu0 %v817_v8  ;;  %v837_v28 = vld [vmem:[%s951_s6 + $0x20] ss:$12 sps:$4 sm:$0xff]   ;;  %v840_v30 = vld [vmem:[%s951_s6 + $0x18] ss:$12 sps:$4 sm:$0xff]   ;;  %v848_v35 = vld [vmem:[%s951_s6 + $0x48] ss:$12 sps:$4 sm:$0xff]  }
  0x17   : > { %781 = vmatpush3.bf16.msra.mxu1 %v818_v9  ;;  %v980_v38 = vld [vmem:[%s1017_s2] ss:$0 sm:$0xff] }
  0x18   : > { %782 = vmatprep.subr.bf16.mxu1 %v821_v12 }
  0x19   : > { %731 = vmatpush3.bf16.msra.mxu0 %v819_v10 }
  0x1a   : > { %732 = vmatprep.subr.bf16.mxu0 %v820_v11 }
  0x1b   : > { %783 = vmatpush3.bf16.msra.mxu1 %v821_v12 }
  0x1c   : > { %784 = vmatprep.subr.bf16.mxu1 %v824_v14 }
  0x1d   : > { %733 = vmatpush3.bf16.msra.mxu0 %v822_v13 }
  0x1e   : > { %734 = vmatprep.subr.bf16.mxu0 %v823_v15 }
  0x1f   : > { %785 = vmatpush3.bf16.msra.mxu1 %v824_v14 }
  0x20   : > { %786 = vmatprep.subr.bf16.mxu1 %v827_v17 }
  0x21   : > { %735 = vmatpush3.bf16.msra.mxu0 %v825_v16 }
  0x22   : > { %736 = vmatprep.subr.bf16.mxu0 %v826_v18 }
  0x23   : > { %787 = vmatpush3.bf16.msra.mxu1 %v827_v17 }
  0x24   : > { %788 = vmatprep.subr.bf16.mxu1 %v830_v21 }
  0x25   : > { %737 = vmatpush3.bf16.msra.mxu0 %v828_v19 }
  0x26   : > { %738 = vmatprep.subr.bf16.mxu0 %v829_v20 }
  0x27   : > { %789 = vmatpush3.bf16.msra.mxu1 %v830_v21 }
  0x28   : > { %790 = vmatprep.subr.bf16.mxu1 %v835_v25 }
  0x29   : > { %739 = vmatpush3.bf16.msra.mxu0 %v831_v23 }
  0x2b   : > { %791 = vmatpush3.bf16.msra.mxu1 %v835_v25 }
  0x2c   : > { %490 = vmatmul.mubr.bf16.vlgmr.msra.gmra.mxu0 %v832_v26 }
  0x2d   : > { %497 = vmatprep.mubr.bf16.mxu0 %v838_v27 }
  0x2e   : > { %793 = vmatmul.mubr.bf16.vlgmr.msra.gmra.mxu1 %v837_v28 }
  0x2f   : > { %796 = vmatprep.mubr.bf16.mxu1 %v844_v29 }
  0x34   : > { %498 = vmatmul.mubr.bf16.gmra.mxu0 %v840_v30 }
  0x35   : > { %505 = vmatprep.mubr.bf16.mxu0 %v841_v31 }
  0x36   : > { %797 = vmatmul.mubr.bf16.gmra.mxu1 %v845_v32 }
  0x3c   : > { %506 = vmatmul.mubr.bf16.gmra.mxu0 %v843_v33 }
  0x3d   : > { %513 = vmatprep.mubr.bf16.mxu0 %v846_v34 }
  0x44   : > { %514 = vmatmul.mubr.bf16.gmra.mxu0 %v848_v35 }
  0xec   : > { %v740_v36 = vpop.f32.mrf.mxu0 }
  0xee   : > { %v741_v37 = vpop.f32.mrf.mxu0  ;;  %v794_v40 = vpop.f32.mrf.mxu1 }
  0xef   : > { %v742_v39 = vadd.f32 %v741_v37, %v740_v36 }
  0xf0   : > { %v743_v41 = vpop.f32.mrf.mxu0  ;;  %v556_v43 = vpop.f32.mrf.mxu1 }
  0xf1   : > { %v492_v42 = vadd.f32 %v742_v39, %v980_v38 }
  0xf2   : > { %v744_v44 = vpop.f32.mrf.mxu0  ;;  %v795_v47 = vpop.f32.mrf.mxu1 }
  0xf3   : > { %v745_v45 = vadd.f32 %v744_v44, %v743_v41  ;;  %v557_v46 = vadd.f32 %v556_v43, %v492_v42 }
  0xf4   : > { %v746_v48 = vpop.f32.mrf.mxu0  ;;  %v559_v51 = vpop.f32.mrf.mxu1 }
  0xf5   : > { %vm587_vm0 = vcmp.ge.f32.partialorder %v557_v46, 0.0  ;;  %v595_v49 = vmul.f32 0.01, %v557_v46  ;;  %v495_v50 = vadd.f32 %v745_v45, %v980_v38 }
  0xf6   : > { %v747_v52 = vpop.f32.mrf.mxu0  ;;  %v798_v57 = vpop.f32.mrf.mxu1 }
  0xf7   : > { %v603_v53 = vsel %vm587_vm0, %v557_v46, %v595_v49  ;;  %v748_v54 = vadd.f32 %v747_v52, %v746_v48  ;;  %v560_v55 = vadd.f32 %v559_v51, %v495_v50 }
  0xf8   : > { %612 = vst.msk [vmem:[%s987_s21] sm:$0xff] %vm611_vm1, %v603_v53  ;;  %v749_v56 = vpop.f32.mrf.mxu0  ;;  %v572_v1 = vpop.f32.mrf.mxu1 }
  0xf9   : > { %v500_v58 = vadd.f32 %v748_v54, %v980_v38  ;;  %vm588_vm2 = vcmp.ge.f32.partialorder %v560_v55, 0.0  ;;  %v596_v59 = vmul.f32 0.01, %v560_v55 }
  0xfa   : > { %v750_v60 = vpop.f32.mrf.mxu0  ;;  %v799_v9 = vpop.f32.mrf.mxu1 }
  0xfb   : > { %v565_v61 = vadd.f32 %v794_v40, %v500_v58  ;;  %v604_v62 = vsel %vm588_vm2, %v560_v55, %v596_v59  ;;  %v751_v63 = vadd.f32 %v750_v60, %v749_v56 }
  0xfc   : > { %613 = vst.msk [vmem:[%s987_s21 + $0x8] sm:$0xff] %vm611_vm1, %v604_v62  ;;  %v752_v0 = vpop.f32.mrf.mxu0  ;;  %v575_v17 = vpop.f32.mrf.mxu1 }
  0xfd   : > { %vm589_vm3 = vcmp.ge.f32.partialorder %v565_v61, 0.0  ;;  %v597_v2 = vmul.f32 0.01, %v565_v61  ;;  %v503_v3 = vadd.f32 %v751_v63, %v980_v38 }
  0xfe   : > { %v753_v4 = vpop.f32.mrf.mxu0 }
  0xff   : > { %v605_v5 = vsel %vm589_vm3, %v565_v61, %v597_v2  ;;  %v568_v6 = vadd.f32 %v795_v47, %v503_v3  ;;  %v754_v7 = vadd.f32 %v753_v4, %v752_v0 }
 0x100   : > { %614 = vst.msk [vmem:[%s987_s21 + $0x10] sm:$0xff] %vm611_vm1, %v605_v5  ;;  %v755_v8 = vpop.f32.mrf.mxu0 }
 0x101   : > { %vm590_vm4 = vcmp.ge.f32.partialorder %v568_v6, 0.0  ;;  %v598_v10 = vmul.f32 0.01, %v568_v6  ;;  %v508_v11 = vadd.f32 %v754_v7, %v980_v38 }
 0x102   : > { %v756_v12 = vpop.f32.mrf.mxu0 }
 0x103   : > { %v606_v13 = vsel %vm590_vm4, %v568_v6, %v598_v10  ;;  %v757_v14 = vadd.f32 %v756_v12, %v755_v8  ;;  %v573_v15 = vadd.f32 %v572_v1, %v508_v11 }
 0x104   : > { %615 = vst.msk [vmem:[%s987_s21 + $0x18] sm:$0xff] %vm611_vm1, %v606_v13  ;;  %v758_v16 = vpop.f32.mrf.mxu0 }
 0x105   : > { %vm591_vm5 = vcmp.ge.f32.partialorder %v573_v15, 0.0  ;;  %v599_v18 = vmul.f32 0.01, %v573_v15  ;;  %v511_v19 = vadd.f32 %v757_v14, %v980_v38 }
 0x106   : > { %v759_v20 = vpop.f32.mrf.mxu0 }
 0x107   : > { %v607_v21 = vsel %vm591_vm5, %v573_v15, %v599_v18  ;;  %v760_v22 = vadd.f32 %v759_v20, %v758_v16  ;;  %v576_v23 = vadd.f32 %v575_v17, %v511_v19 }
 0x108   : > { %616 = vst.msk [vmem:[%s987_s21 + $0x20] sm:$0xff] %vm611_vm1, %v607_v21  ;;  %v761_v24 = vpop.f32.mrf.mxu0 }
 0x109   : > { %v516_v25 = vadd.f32 %v760_v22, %v980_v38  ;;  %vm592_vm6 = vcmp.ge.f32.partialorder %v576_v23, 0.0  ;;  %v600_v26 = vmul.f32 0.01, %v576_v23 }
 0x10a   : > { %v762_v27 = vpop.f32.mrf.mxu0 }
 0x10b   : > { %v581_v28 = vadd.f32 %v798_v57, %v516_v25  ;;  %v608_v29 = vsel %vm592_vm6, %v576_v23, %v600_v26  ;;  %v763_v30 = vadd.f32 %v762_v27, %v761_v24 }
 0x10c   : > { %617 = vst.msk [vmem:[%s987_s21 + $0x28] sm:$0xff] %vm611_vm1, %v608_v29 }
 0x10d   : > { %vm593_vm7 = vcmp.ge.f32.partialorder %v581_v28, 0.0  ;;  %v601_v31 = vmul.f32 0.01, %v581_v28  ;;  %v519_v32 = vadd.f32 %v763_v30, %v980_v38 }
 0x10f   : > { %v609_v33 = vsel %vm593_vm7, %v581_v28, %v601_v31  ;;  %v584_v34 = vadd.f32 %v799_v9, %v519_v32 }
 0x110   : > { %618 = vst.msk [vmem:[%s987_s21 + $0x30] sm:$0xff] %vm611_vm1, %v609_v33 }
 0x111   : > { %vm594_vm8 = vcmp.ge.f32.partialorder %v584_v34, 0.0  ;;  %v602_v35 = vmul.f32 0.01, %v584_v34 }
 0x113   : > { %v610_v36 = vsel %vm594_vm8, %v584_v34, %v602_v35 }
 0x114   : > { %619 = vst.msk [vmem:[%s987_s21 + $0x38] sm:$0xff] %vm611_vm1, %v610_v36 }
 0x115 PF: > { %s13_s12 = sadd.s32 1, %s855_s12  }
 0x116   : > { %p10_p4 = scmp.ge.s32.totalorder %s13_s12, 4  }
 0x118   :  { %12 = sbr.rel (!%p10_p4) target bundleno = 1 (0x1), region = 62 }

// kernel: critic_forward.4
= control target key start
LH: loop header
LB: loop body
LE: loop exit
PB: predicated region body
PF: predicated region fallthrough
CT: control target
= control target key end

     0   :  { %s1446_s15 = smov 0   ;;  %s1912_s0 = inlined_call_operand.vmem [shape: bf16[128,640], index: 0, kind: input, shape index: {}]   ;;  %s1913_s1 = inlined_call_operand.vmem [shape: bf16[640,64], index: 1, kind: input, shape index: {}]   ;;  %s1914_s2 = inlined_call_operand.vmem [shape: f32[1,64], index: 2, kind: input, shape index: {}]   ;;  %s1915_s3 = inlined_call_operand.vmem [shape: f32[1,64], index: 3, kind: input, shape index: {}]   ;;  %s1916_s4 = inlined_call_operand.vmem [shape: f32[128,64], index: 4, kind: output, shape index: {}]  }
   0x1 LB: > { %s1452_s16 = sadd.s32 4294967295, %s1419_s15   ;;  %p1133_p0 = scmp.ge.s32.totalorder %s1419_s15, 1  ;;  %s1419_s15 = sphi %s1446_s15, %s14_s15  }
   0x2   : > { %p159_p1 = scmp.lt.s32.totalorder %s1419_s15, 3 }
   0x4   : > { %p160_p2 = pnand %p1133_p0, %p159_p1 }
   0x5   : > { %s1134_s23 = sshll.u32 (!%p160_p2), %s1452_s16, 3  ;;  %s1196_s5 = sshll.u32 (!%p160_p2), %s1452_s16, 6 }
   0x6   : > { %163 = sbr.rel (%p160_p2) target bundleno = 427 (0x1ab), region = 36  ;;  %p182_p3 = scmp.lt.s32.totalorder (!%p160_p2), %s1134_s23, 15 }
   0x7   : > { %p1197_p4 = scmp.ne.s32.totalorder (!%p160_p2), %s1452_s16, 1 }
   0xb   : > { %v1343_v0 = vld [vmem:[%s1913_s1 + $0x78] sm:$0xff]   ;;  %v1347_v4 = vld [vmem:[%s1913_s1 + $0x70] sm:$0xff]   ;;  %v1351_v8 = vld [vmem:[%s1913_s1 + $0x68] sm:$0xff]   ;;  %s1918_s23 = smov (!%p182_p3, %s1134_s23), 15  ;;  %vm834_vm0 = vcmask 523264  }
   0xc   : > { %v1344_v1 = vld [vmem:[%s1913_s1 + $0xf8] sm:$0xff]   ;;  %1202 = vmatprep.subr.bf16.mxu0 %v1343_v0  ;;  %v1348_v5 = vld [vmem:[%s1913_s1 + $0xf0] sm:$0xff]   ;;  %v1352_v9 = vld [vmem:[%s1913_s1 + $0xe8] sm:$0xff]   ;;  %s1334_s22 = smul.u32 20, %s1918_s23 }
   0xd   : > { %v1345_v2 = vld [vmem:[%s1913_s1 + $0x38] sm:$0xff]   ;;  %1242 = vmatprep.subr.bf16.mxu1 %v1344_v1  ;;  %v1349_v6 = vld [vmem:[%s1913_s1 + $0x30] sm:$0xff]   ;;  %v1353_v10 = vld [vmem:[%s1913_s1 + $0x28] sm:$0xff]  }
   0xe   : > { %v1346_v3 = vld [vmem:[%s1913_s1 + $0xb8] sm:$0xff]   ;;  %1203 = vmatpush3.bf16.msra.mxu0 %v1345_v2  ;;  %v1350_v7 = vld [vmem:[%s1913_s1 + $0xb0] sm:$0xff]   ;;  %v1354_v11 = vld [vmem:[%s1913_s1 + $0xa8] sm:$0xff]   ;;  %s1550_s7 = scalar_lea.vmem %s1912_s0, %s1334_s22 }
   0xf   : > { %1243 = vmatpush3.bf16.msra.mxu1 %v1346_v3  ;;  %1204 = vmatprep.subr.bf16.mxu0 %v1347_v4  ;;  %v1355_v12 = vld [vmem:[%s1913_s1 + $0x60] sm:$0xff]   ;;  %v1359_v16 = vld [vmem:[%s1913_s1 + $0x58] sm:$0xff]   ;;  %v1363_v20 = vld [vmem:[%s1913_s1 + $0x50] sm:$0xff]  }
  0x10   : > { %1244 = vmatprep.subr.bf16.mxu1 %v1348_v5  ;;  %v1356_v13 = vld [vmem:[%s1913_s1 + $0xe0] sm:$0xff]   ;;  %v1360_v17 = vld [vmem:[%s1913_s1 + $0xd8] sm:$0xff]   ;;  %v1364_v21 = vld [vmem:[%s1913_s1 + $0xd0] sm:$0xff]  }
  0x11   : > { %v1357_v14 = vld [vmem:[%s1913_s1 + $0x20] sm:$0xff]   ;;  %v1361_v18 = vld [vmem:[%s1913_s1 + $0x18] sm:$0xff]   ;;  %v1365_v22 = vld [vmem:[%s1913_s1 + $0x10] sm:$0xff]  }
  0x12   : > { %1205 = vmatpush3.bf16.msra.mxu0 %v1349_v6  ;;  %v1358_v15 = vld [vmem:[%s1913_s1 + $0xa0] sm:$0xff]   ;;  %v1362_v19 = vld [vmem:[%s1913_s1 + $0x98] sm:$0xff]   ;;  %v1366_v23 = vld [vmem:[%s1913_s1 + $0x90] sm:$0xff]  }
  0x13   : > { %1245 = vmatpush3.bf16.msra.mxu1 %v1350_v7  ;;  %1206 = vmatprep.subr.bf16.mxu0 %v1351_v8  ;;  %v1367_v24 = vld [vmem:[%s1913_s1 + $0x48] sm:$0xff]   ;;  %v1371_v28 = vld [vmem:[%s1913_s1 + $0x40] sm:$0xff]   ;;  %v1381_v36 = vld [vmem:[%s1913_s1 + $0x138] sm:$0xff]  }
  0x14   : > { %1246 = vmatprep.subr.bf16.mxu1 %v1352_v9  ;;  %v1368_v25 = vld [vmem:[%s1913_s1 + $0xc8] sm:$0xff]   ;;  %v1372_v29 = vld [vmem:[%s1913_s1 + $0xc0] sm:$0xff]   ;;  %v1382_v37 = vld [vmem:[%s1913_s1 + $0x130] sm:$0xff]  }
  0x15   : > { %v1369_v26 = vld [vmem:[%s1913_s1 + $0x8] sm:$0xff]   ;;  %v1373_v30 = vld [vmem:[%s1913_s1] sm:$0xff]   ;;  %v1393_v45 = vld [vmem:[%s1550_s7 + $0x5c] ss:$20 sps:$4 sm:$0xff]  }
  0x16   : > { %1207 = vmatpush3.bf16.msra.mxu0 %v1353_v10  ;;  %v1370_v27 = vld [vmem:[%s1913_s1 + $0x88] sm:$0xff]   ;;  %v1374_v31 = vld [vmem:[%s1913_s1 + $0x80] sm:$0xff]   ;;  %v1397_v46 = vld [vmem:[%s1913_s1 + $0x118] sm:$0xff]  }
  0x17   : > { %1247 = vmatpush3.bf16.msra.mxu1 %v1354_v11  ;;  %1208 = vmatprep.subr.bf16.mxu0 %v1355_v12  ;;  %v1375_v32 = vld [vmem:[%s1550_s7] ss:$20 sps:$4 sm:$0xff]   ;;  %v1377_v33 = vld [vmem:[%s1550_s7 + $0x4] ss:$20 sps:$4 sm:$0xff]   ;;  %v1378_v34 = vld [vmem:[%s1550_s7 + $0x8] ss:$20 sps:$4 sm:$0xff]  }
  0x18   : > { %1248 = vmatprep.subr.bf16.mxu1 %v1356_v13  ;;  %v1380_v35 = vld [vmem:[%s1550_s7 + $0xc] ss:$20 sps:$4 sm:$0xff]   ;;  %669 = vmatprep.mubr.bf16.mxu0 %v1377_v33  ;;  %v1385_v39 = vld [vmem:[%s1550_s7 + $0x34] ss:$20 sps:$4 sm:$0xff]   ;;  %v1388_v42 = vld [vmem:[%s1550_s7 + $0x30] ss:$20 sps:$4 sm:$0xff]  }
  0x19   : > { %734 = vmatprep.mubr.bf16.mxu1 %v1380_v35  ;;  %v1383_v38 = vld [vmem:[%s1550_s7 + $0x2c] ss:$20 sps:$4 sm:$0xff]   ;;  %v1387_v40 = vld [vmem:[%s1550_s7 + $0x28] ss:$20 sps:$4 sm:$0xff]   ;;  %v1395_v47 = vld [vmem:[%s1550_s7 + $0x50] ss:$20 sps:$4 sm:$0xff]  }
  0x1a   : > { %1209 = vmatpush3.bf16.msra.mxu0 %v1357_v14  ;;  %v1389_v41 = vld [vmem:[%s1913_s1 + $0x128] sm:$0xff]   ;;  %v1390_v44 = vld [vmem:[%s1913_s1 + $0x120] sm:$0xff]   ;;  %v1399_v49 = vld [vmem:[%s1550_s7 + $0x7c] ss:$20 sps:$4 sm:$0xff]  }
  0x1b   : > { %1249 = vmatpush3.bf16.msra.mxu1 %v1358_v15  ;;  %1210 = vmatprep.subr.bf16.mxu0 %v1359_v16  ;;  %v1391_v43 = vld [vmem:[%s1550_s7 + $0x54] ss:$20 sps:$4 sm:$0xff]   ;;  %v1396_v48 = vld [vmem:[%s1550_s7 + $0x58] ss:$20 sps:$4 sm:$0xff]   ;;  %v1407_v55 = vld [vmem:[%s1550_s7 + $0x10] ss:$20 sps:$4 sm:$0xff]  }
  0x1c   : > { %1250 = vmatprep.subr.bf16.mxu1 %v1360_v17  ;;  %v1401_v50 = vld [vmem:[%s1550_s7 + $0x84] ss:$20 sps:$4 sm:$0xff]   ;;  %v1398_v51 = vld [vmem:[%s1913_s1 + $0x110] sm:$0xff]   ;;  %v1405_v52 = vld [vmem:[%s1913_s1 + $0x108] sm:$0xff]  }
  0x1d   : > { %v1403_v53 = vld [vmem:[%s1550_s7 + $0x78] ss:$20 sps:$4 sm:$0xff]   ;;  %v1404_v54 = vld [vmem:[%s1550_s7 + $0x80] ss:$20 sps:$4 sm:$0xff]   ;;  %v1410_v59 = vld [vmem:[%s1550_s7 + $0x88] ss:$20 sps:$4 sm:$0xff]  }
  0x1e   : > { %1211 = vmatpush3.bf16.msra.mxu0 %v1361_v18  ;;  %v1408_v56 = vld [vmem:[%s1550_s7 + $0x60] ss:$20 sps:$4 sm:$0xff]   ;;  %v1409_v58 = vld [vmem:[%s1550_s7 + $0x38] ss:$20 sps:$4 sm:$0xff]   ;;  %s1606_s7 = scalar_lea.vmem %s1916_s4, %s1196_s5 }
  0x1f   : > { %1251 = vmatpush3.bf16.msra.mxu1 %v1362_v19  ;;  %1212 = vmatprep.subr.bf16.mxu0 %v1363_v20  ;;  %v1406_v57 = vld [vmem:[%s1913_s1 + $0x100] sm:$0xff]  }
  0x20   : > { %1252 = vmatprep.subr.bf16.mxu1 %v1364_v21 }
  0x22   : > { %1213 = vmatpush3.bf16.msra.mxu0 %v1365_v22 }
  0x23   : > { %1253 = vmatpush3.bf16.msra.mxu1 %v1366_v23  ;;  %1214 = vmatprep.subr.bf16.mxu0 %v1367_v24 }
  0x24   : > { %1254 = vmatprep.subr.bf16.mxu1 %v1368_v25 }
  0x26   : > { %1215 = vmatpush3.bf16.msra.mxu0 %v1369_v26 }
  0x27   : > { %1255 = vmatpush3.bf16.msra.mxu1 %v1370_v27  ;;  %1216 = vmatprep.subr.bf16.mxu0 %v1371_v28 }
  0x28   : > { %1256 = vmatprep.subr.bf16.mxu1 %v1372_v29 }
  0x2a   : > { %1217 = vmatpush3.bf16.msra.mxu0 %v1373_v30 }
  0x2b   : > { %1257 = vmatpush3.bf16.msra.mxu1 %v1374_v31  ;;  %1294 = vmatprep.subr.bf16.mxu0 %v1381_v36 }
  0x2c   : > { %1318 = vmatprep.subr.bf16.mxu1 %v1381_v36 }
  0x2d   : > { %670 = vmatmul.mubr.bf16.vlgmr.msra.gmra.mxu0 %v1375_v32 }
  0x2e   : > { %735 = vmatmul.mubr.bf16.vlgmr.msra.gmra.mxu1 %v1378_v34  ;;  %1295 = vmatpush3.bf16.msra.mxu0 %v1381_v36 }
  0x2f   : > { %1326 = vmatpush3.bf16.msra.mxu1 %v1381_v36  ;;  %1296 = vmatprep.subr.bf16.mxu0 %v1382_v37 }
  0x30   : > { %1319 = vmatprep.subr.bf16.mxu1 %v1382_v37  ;;  %677 = vmatprep.mubr.bf16.mxu0 %v1383_v38 }
  0x31   : > { %742 = vmatprep.mubr.bf16.mxu1 %v1385_v39 }
  0x32   : > { %1297 = vmatpush3.bf16.msra.mxu0 %v1382_v37 }
  0x33   : > { %1327 = vmatpush3.bf16.msra.mxu1 %v1382_v37  ;;  %1298 = vmatprep.subr.bf16.mxu0 %v1389_v41 }
  0x34   : > { %1320 = vmatprep.subr.bf16.mxu1 %v1389_v41 }
  0x35   : > { %678 = vmatmul.mubr.bf16.gmra.mxu0 %v1387_v40 }
  0x36   : > { %743 = vmatmul.mubr.bf16.gmra.mxu1 %v1388_v42  ;;  %685 = vmatprep.mubr.bf16.mxu0 %v1391_v43 }
  0x37   : > { %1299 = vmatpush3.bf16.msra.mxu0 %v1389_v41  ;;  %750 = vmatprep.mubr.bf16.mxu1 %v1393_v45 }
  0x38   : > { %1328 = vmatpush3.bf16.msra.mxu1 %v1389_v41  ;;  %1300 = vmatprep.subr.bf16.mxu0 %v1390_v44 }
  0x39   : > { %1321 = vmatprep.subr.bf16.mxu1 %v1390_v44 }
  0x3b   : > { %1301 = vmatpush3.bf16.msra.mxu0 %v1390_v44 }
  0x3c   : > { %1329 = vmatpush3.bf16.msra.mxu1 %v1390_v44  ;;  %1302 = vmatprep.subr.bf16.mxu0 %v1397_v46 }
  0x3d   : > { %686 = vmatmul.mubr.bf16.gmra.mxu0 %v1395_v47  ;;  %1322 = vmatprep.subr.bf16.mxu1 %v1397_v46 }
  0x3e   : > { %751 = vmatmul.mubr.bf16.gmra.mxu1 %v1396_v48  ;;  %693 = vmatprep.mubr.bf16.mxu0 %v1399_v49 }
  0x3f   : > { %1303 = vmatpush3.bf16.msra.mxu0 %v1397_v46  ;;  %758 = vmatprep.mubr.bf16.mxu1 %v1401_v50 }
  0x40   : > { %1330 = vmatpush3.bf16.msra.mxu1 %v1397_v46  ;;  %1304 = vmatprep.subr.bf16.mxu0 %v1398_v51 }
  0x41   : > { %1323 = vmatprep.subr.bf16.mxu1 %v1398_v51 }
  0x43   : > { %1305 = vmatpush3.bf16.msra.mxu0 %v1398_v51 }
  0x44   : > { %1331 = vmatpush3.bf16.msra.mxu1 %v1398_v51  ;;  %1306 = vmatprep.subr.bf16.mxu0 %v1405_v52 }
  0x45   : > { %694 = vmatmul.mubr.bf16.gmra.mxu0 %v1403_v53  ;;  %1324 = vmatprep.subr.bf16.mxu1 %v1405_v52 }
  0x46   : > { %759 = vmatmul.mubr.bf16.gmra.mxu1 %v1404_v54  ;;  %1310 = vmatprep.mubr.bf16.mxu0 %v1407_v55 }
  0x47   : > { %1307 = vmatpush3.bf16.msra.mxu0 %v1405_v52  ;;  %1314 = vmatprep.mubr.bf16.mxu1 %v1408_v56 }
  0x48   : > { %1332 = vmatpush3.bf16.msra.mxu1 %v1405_v52  ;;  %1308 = vmatprep.subr.bf16.mxu0 %v1406_v57 }
  0x49   : > { %1325 = vmatprep.subr.bf16.mxu1 %v1406_v57 }
  0x4b   : > { %1309 = vmatpush3.bf16.msra.mxu0 %v1406_v57 }
  0x4c   : > { %1333 = vmatpush3.bf16.msra.mxu1 %v1406_v57 }
  0x4e   : > { %1311 = vmatmul.mubr.bf16.vlgmr.msra.gmra.mxu0 %v1409_v58 }
  0x4f   : > { %1315 = vmatmul.mubr.bf16.vlgmr.msra.gmra.mxu1 %v1410_v59 }
  0xed   : > { %v1218_v60 = vpop.f32.mrf.mxu0 }
  0xee   : > { %v1258_v61 = vpop.f32.mrf.mxu1 }
  0xef   : > { %v1219_v62 = vpop.f32.mrf.mxu0 }
  0xf0   : > { %v1259_v63 = vpop.f32.mrf.mxu1  ;;  %v1220_v30 = vadd.f32 %v1219_v62, %v1218_v60 }
  0xf1   : > { %v1221_v0 = vpop.f32.mrf.mxu0  ;;  %v1260_v31 = vadd.f32 %v1259_v63, %v1258_v61 }
  0xf2   : > { %v1261_v1 = vpop.f32.mrf.mxu1 }
  0xf3   : > { %v1222_v2 = vpop.f32.mrf.mxu0  ;;  %v737_v47 = vadd.f32 %v1260_v31, %v1220_v30 }
  0xf4   : > { %v1262_v3 = vpop.f32.mrf.mxu1  ;;  %v1223_v43 = vadd.f32 %v1222_v2, %v1221_v0 }
  0xf5   : > { %v1224_v4 = vpop.f32.mrf.mxu0  ;;  %v1263_v44 = vadd.f32 %v1262_v3, %v1261_v1 }
  0xf6   : > { %v1264_v5 = vpop.f32.mrf.mxu1 }
  0xf7   : > { %v1225_v6 = vpop.f32.mrf.mxu0  ;;  %v740_v61 = vadd.f32 %v1263_v44, %v1223_v43 }
  0xf8   : > { %v1265_v7 = vpop.f32.mrf.mxu1  ;;  %v1226_v24 = vadd.f32 %v1225_v6, %v1224_v4 }
  0xf9   : > { %v1227_v8 = vpop.f32.mrf.mxu0  ;;  %v1266_v25 = vadd.f32 %v1265_v7, %v1264_v5 }
  0xfa   : > { %v1267_v9 = vpop.f32.mrf.mxu1 }
  0xfb   : > { %v1228_v10 = vpop.f32.mrf.mxu0  ;;  %v745_v38 = vadd.f32 %v1266_v25, %v1226_v24 }
  0xfc   : > { %v1268_v11 = vpop.f32.mrf.mxu1  ;;  %v1229_v36 = vadd.f32 %v1228_v10, %v1227_v8 }
  0xfd   : > { %v1230_v12 = vpop.f32.mrf.mxu0  ;;  %v1269_v37 = vadd.f32 %v1268_v11, %v1267_v9 }
  0xfe   : > { %v1270_v13 = vpop.f32.mrf.mxu1 }
  0xff   : > { %v1231_v14 = vpop.f32.mrf.mxu0  ;;  %v748_v55 = vadd.f32 %v1269_v37, %v1229_v36 }
 0x100   : > { %v1271_v15 = vpop.f32.mrf.mxu1  ;;  %v1232_v33 = vadd.f32 %v1231_v14, %v1230_v12 }
 0x101   : > { %v1233_v16 = vpop.f32.mrf.mxu0  ;;  %v1272_v34 = vadd.f32 %v1271_v15, %v1270_v13 }
 0x102   : > { %v1273_v17 = vpop.f32.mrf.mxu1 }
 0x103   : > { %v1234_v18 = vpop.f32.mrf.mxu0  ;;  %v753_v52 = vadd.f32 %v1272_v34, %v1232_v33 }
 0x104   : > { %v1274_v19 = vpop.f32.mrf.mxu1  ;;  %v1235_v48 = vadd.f32 %v1234_v18, %v1233_v16 }
 0x105   : > { %v1236_v20 = vpop.f32.mrf.mxu0  ;;  %v1275_v49 = vadd.f32 %v1274_v19, %v1273_v17 }
 0x106   : > { %v1276_v21 = vpop.f32.mrf.mxu1 }
 0x107   : > { %v1237_v22 = vpop.f32.mrf.mxu0  ;;  %v756_v0 = vadd.f32 %v1275_v49, %v1235_v48 }
 0x108   : > { %v1277_v23 = vpop.f32.mrf.mxu1  ;;  %v1238_v27 = vadd.f32 %v1237_v22, %v1236_v20 }
 0x109   : > { %v1239_v26 = vpop.f32.mrf.mxu0  ;;  %v1278_v28 = vadd.f32 %v1277_v23, %v1276_v21 }
 0x10a   : > { %v1279_v29 = vpop.f32.mrf.mxu1 }
 0x10b   : > { %v1240_v32 = vpop.f32.mrf.mxu0  ;;  %v761_v42 = vadd.f32 %v1278_v28, %v1238_v27 }
 0x10c   : > { %v1280_v35 = vpop.f32.mrf.mxu1  ;;  %v1241_v39 = vadd.f32 %v1240_v32, %v1239_v26 }
 0x10d   : > { %v1281_v40 = vadd.f32 %v1280_v35, %v1279_v29 }
 0x10e   : > { %v1312_v41 = vpop.f32.mrf.mxu0 }
 0x10f   : > { %v810_v45 = vadd.f32 %v1312_v41, %v745_v38  ;;  %v1316_v46 = vpop.f32.mrf.mxu1  ;;  %v764_v58 = vadd.f32 %v1281_v40, %v1241_v39 }
 0x110   : > { %v826_v50 = vadd.f32 %v1316_v46, %v761_v42  ;;  %v801_v51 = vpop.f32.mrf.mxu0 }
 0x111   : > { %837 = vst.msk [vmem:[%s1606_s7 + $0x10] sm:$0xff] %vm834_vm0, %v810_v45  ;;  %v802_v53 = vadd.f32 %v801_v51, %v737_v47  ;;  %v817_v54 = vpop.f32.mrf.mxu1 }
 0x112   : > { %841 = vst.msk [vmem:[%s1606_s7 + $0x30] sm:$0xff] %vm834_vm0, %v826_v50  ;;  %v818_v56 = vadd.f32 %v817_v54, %v753_v52  ;;  %v1313_v57 = vpop.f32.mrf.mxu0 }
 0x113   : > { %835 = vst.msk [vmem:[%s1606_s7] sm:$0xff] %vm834_vm0, %v802_v53  ;;  %v813_v59 = vadd.f32 %v1313_v57, %v748_v55  ;;  %v1317_v60 = vpop.f32.mrf.mxu1 }
 0x114   : > { %839 = vst.msk [vmem:[%s1606_s7 + $0x20] sm:$0xff] %vm834_vm0, %v818_v56  ;;  %v829_v62 = vadd.f32 %v1317_v60, %v764_v58  ;;  %v804_v63 = vpop.f32.mrf.mxu0  ;;  %846 = sbr.rel (%p1197_p4) target bundleno = 427 (0x1ab), region = 40 }
 0x115   : > { %838 = vst.msk [vmem:[%s1606_s7 + $0x18] sm:$0xff] %vm834_vm0, %v813_v59  ;;  %v805_v1 = vadd.f32 %v804_v63, %v740_v61  ;;  %v820_v2 = vpop.f32.mrf.mxu1 }
 0x116   : > { %842 = vst.msk [vmem:[%s1606_s7 + $0x38] sm:$0xff] %vm834_vm0, %v829_v62  ;;  %v821_v3 = vadd.f32 %v820_v2, %v756_v0 }
 0x117   : > { %836 = vst.msk [vmem:[%s1606_s7 + $0x8] sm:$0xff] %vm834_vm0, %v805_v1 }
 0x118   : > { %840 = vst.msk [vmem:[%s1606_s7 + $0x28] sm:$0xff] %vm834_vm0, %v821_v3 }
 0x11f   : > { %v847_v4 = vld [vmem:[%s1916_s4] sm:$0xff]  ;;  %v848_v5 = vld [vmem:[%s1916_s4 + $0x8] sm:$0xff]  ;;  %v849_v6 = vld [vmem:[%s1916_s4 + $0x10] sm:$0xff] }
 0x120   : > { %v850_v7 = vld [vmem:[%s1916_s4 + $0x18] sm:$0xff]  ;;  %v863_v8 = vsel %vm834_vm0, %v847_v4, 0.0  ;;  %v864_v9 = vsel %vm834_vm0, %v848_v5, 0.0  ;;  %v866_v10 = vsel %vm834_vm0, %v849_v6, 0.0  ;;  %v851_v11 = vld [vmem:[%s1916_s4 + $0x20] sm:$0xff]  ;;  %v852_v14 = vld [vmem:[%s1916_s4 + $0x28] sm:$0xff] }
 0x121   : > { %v865_v12 = vadd.f32 %v864_v9, %v863_v8  ;;  %v868_v13 = vsel %vm834_vm0, %v850_v7, 0.0  ;;  %v870_v16 = vsel %vm834_vm0, %v851_v11, 0.0  ;;  %v853_v17 = vld [vmem:[%s1916_s4 + $0x30] sm:$0xff]  ;;  %v872_v19 = vsel %vm834_vm0, %v852_v14, 0.0  ;;  %v854_v20 = vld [vmem:[%s1916_s4 + $0x38] sm:$0xff]  ;;  %v855_v23 = vld [vmem:[%s1916_s4 + $0x40] sm:$0xff] }
 0x122   : > { %v874_v22 = vsel %vm834_vm0, %v853_v17, 0.0  ;;  %v876_v25 = vsel %vm834_vm0, %v854_v20, 0.0  ;;  %v856_v26 = vld [vmem:[%s1916_s4 + $0x48] sm:$0xff]  ;;  %v878_v28 = vsel %vm834_vm0, %v855_v23, 0.0  ;;  %v857_v29 = vld [vmem:[%s1916_s4 + $0x50] sm:$0xff]  ;;  %v858_v32 = vld [vmem:[%s1916_s4 + $0x58] sm:$0xff] }
 0x123   : > { %v867_v15 = vadd.f32 %v866_v10, %v865_v12  ;;  %v880_v31 = vsel %vm834_vm0, %v856_v26, 0.0  ;;  %v882_v34 = vsel %vm834_vm0, %v857_v29, 0.0  ;;  %v859_v35 = vld [vmem:[%s1916_s4 + $0x60] sm:$0xff]  ;;  %v884_v37 = vsel %vm834_vm0, %v858_v32, 0.0  ;;  %v860_v38 = vld [vmem:[%s1916_s4 + $0x68] sm:$0xff]  ;;  %v861_v41 = vld [vmem:[%s1916_s4 + $0x70] sm:$0xff] }
 0x124   : > { %v886_v40 = vsel %vm834_vm0, %v859_v35, 0.0  ;;  %v888_v43 = vsel %vm834_vm0, %v860_v38, 0.0  ;;  %v862_v44 = vld [vmem:[%s1916_s4 + $0x78] sm:$0xff]  ;;  %v890_v46 = vsel %vm834_vm0, %v861_v41, 0.0 }
 0x125   : > { %v869_v18 = vadd.f32 %v868_v13, %v867_v15  ;;  %v892_v48 = vsel %vm834_vm0, %v862_v44, 0.0 }
 0x127   : > { %v871_v21 = vadd.f32 %v870_v16, %v869_v18 }
 0x129   : > { %v873_v24 = vadd.f32 %v872_v19, %v871_v21 }
 0x12b   : > { %v875_v27 = vadd.f32 %v874_v22, %v873_v24 }
 0x12d   : > { %v877_v30 = vadd.f32 %v876_v25, %v875_v27 }
 0x12f   : > { %v879_v33 = vadd.f32 %v878_v28, %v877_v30 }
 0x131   : > { %v881_v36 = vadd.f32 %v880_v31, %v879_v33 }
 0x133   : > { %v883_v39 = vadd.f32 %v882_v34, %v881_v36 }
 0x135   : > { %v885_v42 = vadd.f32 %v884_v37, %v883_v39 }
 0x137   : > { %v887_v45 = vadd.f32 %v886_v40, %v885_v42 }
 0x139   : > { %v889_v47 = vadd.f32 %v888_v43, %v887_v45 }
 0x13b   : > { %v891_v49 = vadd.f32 %v890_v46, %v889_v47 }
 0x13d   : > { %v893_v50 = vadd.f32 %v892_v48, %v891_v49 }
 0x13f   : > { %v894_v51 = vrot.slane %v893_v50, 4 }
 0x141   : > { %v895_v52 = vadd.f32 %v894_v51, %v893_v50 }
 0x143   : > { %v896_v53 = vrot.slane %v895_v52, 2 }
 0x145   : > { %v897_v54 = vadd.f32 %v896_v53, %v895_v52 }
 0x147   : > { %v898_v55 = vrot.slane %v897_v54, 1 }
 0x149   : > { %v899_v56 = vadd.f32 %v898_v55, %v897_v54 }
 0x14b   : > { %v901_v57 = vmul.f32 0.0078125, %v899_v56 }
 0x14d   : > { %v1689_v58 = vsub.f32 %v847_v4, %v901_v57  ;;  %v1691_v59 = vsub.f32 %v848_v5, %v901_v57  ;;  %v1693_v60 = vsub.f32 %v849_v6, %v901_v57  ;;  %v1695_v61 = vsub.f32 %v850_v7, %v901_v57 }
 0x14e   : > { %v1697_v62 = vsub.f32 %v851_v11, %v901_v57  ;;  %v1705_v2 = vsub.f32 %v852_v14, %v901_v57  ;;  %v1709_v4 = vsub.f32 %v853_v17, %v901_v57  ;;  %v1716_v10 = vsub.f32 %v854_v20, %v901_v57 }
 0x14f   : > { %v918_v63 = vmul.f32 %v1689_v58, %v1689_v58  ;;  %v919_v0 = vmul.f32 %v1691_v59, %v1691_v59  ;;  %v920_v1 = vmul.f32 %v1693_v60, %v1693_v60  ;;  %v921_v3 = vmul.f32 %v1695_v61, %v1695_v61 }
 0x150   : > { %v922_v5 = vmul.f32 %v1697_v62, %v1697_v62  ;;  %v923_v11 = vmul.f32 %v1705_v2, %v1705_v2  ;;  %v1721_v14 = vsub.f32 %v855_v23, %v901_v57  ;;  %v924_v15 = vmul.f32 %v1709_v4, %v1709_v4 }
 0x151   : > { %v934_v6 = vsel %vm834_vm0, %v918_v63, 0.0  ;;  %v935_v7 = vsel %vm834_vm0, %v919_v0, 0.0  ;;  %v937_v8 = vsel %vm834_vm0, %v920_v1, 0.0  ;;  %v939_v12 = vsel %vm834_vm0, %v921_v3, 0.0 }
 0x152   : > { %v936_v9 = vadd.f32 %v935_v7, %v934_v6  ;;  %v941_v16 = vsel %vm834_vm0, %v922_v5, 0.0  ;;  %v1726_v18 = vsub.f32 %v856_v26, %v901_v57  ;;  %v925_v19 = vmul.f32 %v1716_v10, %v1716_v10 }
 0x153   : > { %v943_v20 = vsel %vm834_vm0, %v923_v11, 0.0  ;;  %v1731_v22 = vsub.f32 %v857_v29, %v901_v57  ;;  %v926_v23 = vmul.f32 %v1721_v14, %v1721_v14  ;;  %v945_v24 = vsel %vm834_vm0, %v924_v15, 0.0 }
 0x154   : > { %v938_v13 = vadd.f32 %v937_v8, %v936_v9  ;;  %v1736_v27 = vsub.f32 %v858_v32, %v901_v57  ;;  %v927_v26 = vmul.f32 %v1726_v18, %v1726_v18  ;;  %v947_v28 = vsel %vm834_vm0, %v925_v19, 0.0  ;;  %v1774_v9 = vld [vmem:[%s1914_s2] ss:$0 sm:$0xff] }
 0x155   : > { %v1741_v31 = vsub.f32 %v859_v35, %v901_v57  ;;  %v928_v29 = vmul.f32 %v1731_v22, %v1731_v22  ;;  %v949_v33 = vsel %vm834_vm0, %v926_v23, 0.0  ;;  %v1746_v36 = vsub.f32 %v860_v38, %v901_v57 }
 0x156   : > { %v940_v17 = vadd.f32 %v939_v12, %v938_v13  ;;  %v929_v32 = vmul.f32 %v1736_v27, %v1736_v27  ;;  %v951_v37 = vsel %vm834_vm0, %v927_v26, 0.0  ;;  %v1751_v40 = vsub.f32 %v861_v41, %v901_v57 }
 0x157   : > { %v930_v35 = vmul.f32 %v1741_v31, %v1741_v31  ;;  %v953_v42 = vsel %vm834_vm0, %v928_v29, 0.0  ;;  %v1756_v45 = vsub.f32 %v862_v44, %v901_v57  ;;  %v931_v38 = vmul.f32 %v1746_v36, %v1746_v36 }
 0x158   : > { %v942_v21 = vadd.f32 %v941_v16, %v940_v17  ;;  %v955_v46 = vsel %vm834_vm0, %v929_v32, 0.0  ;;  %v932_v48 = vmul.f32 %v1751_v40, %v1751_v40  ;;  %v1787_v16 = vld [vmem:[%s1915_s3] ss:$0 sm:$0xff] }
 0x159   : > { %v957_v41 = vsel %vm834_vm0, %v930_v35, 0.0  ;;  %v933_v50 = vmul.f32 %v1756_v45, %v1756_v45  ;;  %v959_v51 = vsel %vm834_vm0, %v931_v38, 0.0 }
 0x15a   : > { %v944_v25 = vadd.f32 %v943_v20, %v942_v21  ;;  %v961_v44 = vsel %vm834_vm0, %v932_v48, 0.0 }
 0x15b   : > { %v963_v54 = vsel %vm834_vm0, %v933_v50, 0.0 }
 0x15c   : > { %v946_v30 = vadd.f32 %v945_v24, %v944_v25 }
 0x15e   : > { %v948_v34 = vadd.f32 %v947_v28, %v946_v30 }
 0x160   : > { %v950_v39 = vadd.f32 %v949_v33, %v948_v34 }
 0x162   : > { %v952_v43 = vadd.f32 %v951_v37, %v950_v39 }
 0x164   : > { %v954_v47 = vadd.f32 %v953_v42, %v952_v43 }
 0x166   : > { %v956_v49 = vadd.f32 %v955_v46, %v954_v47 }
 0x168   : > { %v958_v52 = vadd.f32 %v957_v41, %v956_v49 }
 0x16a   : > { %v960_v53 = vadd.f32 %v959_v51, %v958_v52 }
 0x16c   : > { %v962_v55 = vadd.f32 %v961_v44, %v960_v53 }
 0x16e   : > { %v964_v56 = vadd.f32 %v963_v54, %v962_v55 }
 0x170   : > { %v965_v57 = vrot.slane %v964_v56, 4 }
 0x172   : > { %v966_v63 = vadd.f32 %v965_v57, %v964_v56 }
 0x174   : > { %v967_v0 = vrot.slane %v966_v63, 2 }
 0x176   : > { %v968_v1 = vadd.f32 %v967_v0, %v966_v63 }
 0x178   : > { %v969_v3 = vrot.slane %v968_v1, 1 }
 0x17a   : > { %v970_v5 = vadd.f32 %v969_v3, %v968_v1 }
 0x17c   : > { %v971_v6 = vmul.f32 0.0078125, %v970_v5 }
 0x17e   : > { %v972_v7 = vadd.f32 1e-05, %v971_v6 }
 0x180   : > { %1411 = vrsqrt.f32 %v972_v7 }
 0x18d   : > { %v1769_v8 = vpop.eup %1411 }
 0x18e   : > { %v974_v11 = vmul.f32 %v1769_v8, %v1689_v58  ;;  %v975_v12 = vmul.f32 %v1769_v8, %v1691_v59  ;;  %v976_v13 = vmul.f32 %v1769_v8, %v1693_v60  ;;  %v977_v15 = vmul.f32 %v1769_v8, %v1695_v61 }
 0x18f   : > { %v978_v17 = vmul.f32 %v1769_v8, %v1697_v62  ;;  %v979_v58 = vmul.f32 %v1769_v8, %v1705_v2  ;;  %v980_v59 = vmul.f32 %v1769_v8, %v1709_v4  ;;  %v981_v60 = vmul.f32 %v1769_v8, %v1716_v10 }
 0x190   : > { %v997_v19 = vmul.f32 %v1774_v9, %v974_v11  ;;  %v998_v61 = vmul.f32 %v1774_v9, %v975_v12  ;;  %v999_v20 = vmul.f32 %v1774_v9, %v976_v13  ;;  %v1000_v21 = vmul.f32 %v1774_v9, %v977_v15 }
 0x191   : > { %v1001_v23 = vmul.f32 %v1774_v9, %v978_v17  ;;  %v1002_v62 = vmul.f32 %v1774_v9, %v979_v58  ;;  %v1003_v2 = vmul.f32 %v1774_v9, %v980_v59  ;;  %v1004_v24 = vmul.f32 %v1774_v9, %v981_v60 }
 0x192   : > { %v1020_v4 = vadd.f32 %v1787_v16, %v997_v19  ;;  %v1021_v10 = vadd.f32 %v1787_v16, %v998_v61  ;;  %v1022_v25 = vadd.f32 %v1787_v16, %v999_v20  ;;  %v1023_v26 = vadd.f32 %v1787_v16, %v1000_v21 }
 0x193   : > { %v1024_v28 = vadd.f32 %v1787_v16, %v1001_v23  ;;  %v1025_v30 = vadd.f32 %v1787_v16, %v1002_v62  ;;  %v1026_v29 = vadd.f32 %v1787_v16, %v1003_v2  ;;  %v1027_v33 = vadd.f32 %v1787_v16, %v1004_v24 }
 0x194   : > { %vm1036_vm1 = vcmp.ge.f32.partialorder %v1020_v4, 0.0  ;;  %v1052_v34 = vmul.f32 0.01, %v1020_v4  ;;  %vm1037_vm2 = vcmp.ge.f32.partialorder %v1021_v10, 0.0  ;;  %v1053_v32 = vmul.f32 0.01, %v1021_v10 }
 0x195   : > { %vm1038_vm3 = vcmp.ge.f32.partialorder %v1022_v25, 0.0  ;;  %v1054_v37 = vmul.f32 0.01, %v1022_v25  ;;  %vm1039_vm4 = vcmp.ge.f32.partialorder %v1023_v26, 0.0  ;;  %v1055_v39 = vmul.f32 0.01, %v1023_v26 }
 0x196   : > { %v1068_v35 = vsel %vm1036_vm1, %v1020_v4, %v1052_v34  ;;  %v1069_v42 = vsel %vm1037_vm2, %v1021_v10, %v1053_v32  ;;  %vm1040_vm5 = vcmp.ge.f32.partialorder %v1024_v28, 0.0  ;;  %v1056_v43 = vmul.f32 0.01, %v1024_v28 }
 0x197   : > { %1084 = vst.msk [vmem:[%s1916_s4] sm:$0xff] %vm834_vm0, %v1068_v35  ;;  %1085 = vst.msk [vmem:[%s1916_s4 + $0x8] sm:$0xff] %vm834_vm0, %v1069_v42  ;;  %v1070_v38 = vsel %vm1038_vm3, %v1022_v25, %v1054_v37  ;;  %v1071_v46 = vsel %vm1039_vm4, %v1023_v26, %v1055_v39  ;;  %vm1041_vm6 = vcmp.ge.f32.partialorder %v1025_v30, 0.0  ;;  %v1057_v47 = vmul.f32 0.01, %v1025_v30 }
 0x198   : > { %1086 = vst.msk [vmem:[%s1916_s4 + $0x10] sm:$0xff] %vm834_vm0, %v1070_v38  ;;  %1087 = vst.msk [vmem:[%s1916_s4 + $0x18] sm:$0xff] %vm834_vm0, %v1071_v46  ;;  %v1072_v48 = vsel %vm1040_vm5, %v1024_v28, %v1056_v43  ;;  %vm1042_vm7 = vcmp.ge.f32.partialorder %v1026_v29, 0.0  ;;  %v1058_v41 = vmul.f32 0.01, %v1026_v29  ;;  %vm1043_vm8 = vcmp.ge.f32.partialorder %v1027_v33, 0.0 }
 0x199   : > { %1088 = vst.msk [vmem:[%s1916_s4 + $0x20] sm:$0xff] %vm834_vm0, %v1072_v48  ;;  %v1073_v49 = vsel %vm1041_vm6, %v1025_v30, %v1057_v47  ;;  %v1059_v50 = vmul.f32 0.01, %v1027_v33  ;;  %v982_v51 = vmul.f32 %v1769_v8, %v1721_v14  ;;  %v983_v52 = vmul.f32 %v1769_v8, %v1726_v18 }
 0x19a   : > { %1089 = vst.msk [vmem:[%s1916_s4 + $0x28] sm:$0xff] %vm834_vm0, %v1073_v49  ;;  %v1074_v44 = vsel %vm1042_vm7, %v1026_v29, %v1058_v41  ;;  %v984_v53 = vmul.f32 %v1769_v8, %v1731_v22  ;;  %v985_v54 = vmul.f32 %v1769_v8, %v1736_v27  ;;  %v986_v55 = vmul.f32 %v1769_v8, %v1741_v31 }
 0x19b   : > { %1090 = vst.msk [vmem:[%s1916_s4 + $0x30] sm:$0xff] %vm834_vm0, %v1074_v44  ;;  %v1075_v14 = vsel %vm1043_vm8, %v1027_v33, %v1059_v50  ;;  %v1005_v18 = vmul.f32 %v1774_v9, %v982_v51  ;;  %v1006_v56 = vmul.f32 %v1774_v9, %v983_v52  ;;  %v987_v57 = vmul.f32 %v1769_v8, %v1746_v36 }
 0x19c   : > { %1091 = vst.msk [vmem:[%s1916_s4 + $0x38] sm:$0xff] %vm834_vm0, %v1075_v14  ;;  %v1007_v22 = vmul.f32 %v1774_v9, %v984_v53  ;;  %v1008_v27 = vmul.f32 %v1774_v9, %v985_v54  ;;  %v1009_v31 = vmul.f32 %v1774_v9, %v986_v55  ;;  %v988_v63 = vmul.f32 %v1769_v8, %v1751_v40 }
 0x19d   : > { %v1028_v0 = vadd.f32 %v1787_v16, %v1005_v18  ;;  %v1029_v1 = vadd.f32 %v1787_v16, %v1006_v56  ;;  %v1010_v36 = vmul.f32 %v1774_v9, %v987_v57  ;;  %v989_v3 = vmul.f32 %v1769_v8, %v1756_v45 }
 0x19e   : > { %v1030_v5 = vadd.f32 %v1787_v16, %v1007_v22  ;;  %v1031_v6 = vadd.f32 %v1787_v16, %v1008_v27  ;;  %v1032_v7 = vadd.f32 %v1787_v16, %v1009_v31  ;;  %v1011_v11 = vmul.f32 %v1774_v9, %v988_v63 }
 0x19f   : > { %vm1044_vm9 = vcmp.ge.f32.partialorder %v1028_v0, 0.0  ;;  %v1060_v12 = vmul.f32 0.01, %v1028_v0  ;;  %vm1045_vm10 = vcmp.ge.f32.partialorder %v1029_v1, 0.0  ;;  %v1061_v40 = vmul.f32 0.01, %v1029_v1 }
 0x1a0   : > { %vm1046_vm11 = vcmp.ge.f32.partialorder %v1030_v5, 0.0  ;;  %v1062_v13 = vmul.f32 0.01, %v1030_v5  ;;  %vm1047_vm12 = vcmp.ge.f32.partialorder %v1031_v6, 0.0  ;;  %v1063_v15 = vmul.f32 0.01, %v1031_v6 }
 0x1a1   : > { %v1076_v17 = vsel %vm1044_vm9, %v1028_v0, %v1060_v12  ;;  %v1077_v58 = vsel %vm1045_vm10, %v1029_v1, %v1061_v40  ;;  %vm1048_vm13 = vcmp.ge.f32.partialorder %v1032_v7, 0.0  ;;  %v1064_v45 = vmul.f32 0.01, %v1032_v7 }
 0x1a2   : > { %1092 = vst.msk [vmem:[%s1916_s4 + $0x40] sm:$0xff] %vm834_vm0, %v1076_v17  ;;  %1093 = vst.msk [vmem:[%s1916_s4 + $0x48] sm:$0xff] %vm834_vm0, %v1077_v58  ;;  %v1078_v8 = vsel %vm1046_vm11, %v1030_v5, %v1062_v13  ;;  %v1079_v59 = vsel %vm1047_vm12, %v1031_v6, %v1063_v15  ;;  %v1033_v60 = vadd.f32 %v1787_v16, %v1010_v36 }
 0x1a3   : > { %v1034_v19 = vadd.f32 %v1787_v16, %v1011_v11  ;;  %1094 = vst.msk [vmem:[%s1916_s4 + $0x50] sm:$0xff] %vm834_vm0, %v1078_v8  ;;  %1095 = vst.msk [vmem:[%s1916_s4 + $0x58] sm:$0xff] %vm834_vm0, %v1079_v59  ;;  %v1080_v61 = vsel %vm1048_vm13, %v1032_v7, %v1064_v45  ;;  %v1012_v20 = vmul.f32 %v1774_v9, %v989_v3 }
 0x1a4   : > { %1096 = vst.msk [vmem:[%s1916_s4 + $0x60] sm:$0xff] %vm834_vm0, %v1080_v61  ;;  %vm1049_vm14 = vcmp.ge.f32.partialorder %v1033_v60, 0.0  ;;  %v1065_v21 = vmul.f32 0.01, %v1033_v60 }
 0x1a5   : > { %vm1050_vm15 = vcmp.ge.f32.partialorder %v1034_v19, 0.0  ;;  %v1066_v23 = vmul.f32 0.01, %v1034_v19  ;;  %v1035_v62 = vadd.f32 %v1787_v16, %v1012_v20 }
 0x1a6   : > { %v1081_v2 = vsel %vm1049_vm14, %v1033_v60, %v1065_v21 }
 0x1a7   : > { %v1082_v24 = vsel %vm1050_vm15, %v1034_v19, %v1066_v23  ;;  %1097 = vst.msk [vmem:[%s1916_s4 + $0x68] sm:$0xff] %vm834_vm0, %v1081_v2  ;;  %vm1051_vm1 = vcmp.ge.f32.partialorder %v1035_v62, 0.0  ;;  %v1067_v9 = vmul.f32 0.01, %v1035_v62 }
 0x1a8   : > { %1098 = vst.msk [vmem:[%s1916_s4 + $0x70] sm:$0xff] %vm834_vm0, %v1082_v24 }
 0x1a9   : > { %v1083_v4 = vsel %vm1051_vm1, %v1035_v62, %v1067_v9 }
 0x1aa   : > { %1099 = vst.msk [vmem:[%s1916_s4 + $0x78] sm:$0xff] %vm834_vm0, %v1083_v4 }
 0x1ab PF: > { %s14_s15 = sadd.s32 1, %s1419_s15  }
 0x1ac   : > { %p11_p5 = scmp.ge.s32.totalorder %s14_s15, 4  }
 0x1ae   :  { %13 = sbr.rel (!%p11_p5) target bundleno = 1 (0x1), region = 67 }

// kernel: critic_forward.5
= control target key start
LH: loop header
LB: loop body
LE: loop exit
PB: predicated region body
PF: predicated region fallthrough
CT: control target
= control target key end

     0   :  { %10 = vsyncpa [#allocation3], 0  ;;  %s1573_s18 = smov 0   ;;  %s1990_s0 = inlined_call_operand.vmem [shape: bf16[128,640], index: 0, kind: input, shape index: {}]   ;;  %s1991_s1 = inlined_call_operand.vmem [shape: bf16[640,64], index: 1, kind: input, shape index: {}]   ;;  %s1992_s2 = inlined_call_operand.vmem [shape: f32[1,64], index: 2, kind: input, shape index: {}]   ;;  %s1993_s3 = inlined_call_operand.vmem [shape: f32[1,64], index: 3, kind: input, shape index: {}]   ;;  %s1994_s4 = inlined_call_operand.vmem [shape: f32[128,64], index: 4, kind: input, shape index: {}]   ;;  %s1995_s5 = inlined_call_operand.hbm [shape: f32[128,64], index: 5, kind: output, shape index: {}]  }
   0x1 LB: > { %s1579_s19 = sadd.s32 4294967295, %s1538_s18   ;;  %p1213_p0 = scmp.ge.s32.totalorder %s1538_s18, 1  ;;  %s1538_s18 = sphi %s1573_s18, %s16_s18  }
   0x2   : > { %p185_p1 = scmp.lt.s32.totalorder %s1538_s18, 3 }
   0x4   : > { %p186_p2 = pnand %p1213_p0, %p185_p1 }
   0x5   : > { %s1214_s27 = sshll.u32 (!%p186_p2), %s1579_s19, 3  ;;  %p1277_p4 = scmp.ne.s32.totalorder (!%p186_p2), %s1579_s19, 1 }
   0x6   : > { %189 = sbr.rel (%p186_p2) target bundleno = 447 (0x1bf), region = 40  ;;  %p210_p3 = scmp.lt.s32.totalorder (!%p186_p2), %s1214_s27, 15 }
   0xb   : > { %v1434_v0 = vld [vmem:[%s1991_s1 + $0x78] sm:$0xff]   ;;  %v1438_v4 = vld [vmem:[%s1991_s1 + $0x70] sm:$0xff]   ;;  %v1442_v8 = vld [vmem:[%s1991_s1 + $0x68] sm:$0xff]   ;;  %s1997_s27 = smov (!%p210_p3, %s1214_s27), 15  ;;  %vm862_vm0 = vcmask 523264  }
   0xc   : > { %v1435_v1 = vld [vmem:[%s1991_s1 + $0xf8] sm:$0xff]   ;;  %1284 = vmatprep.subr.bf16.mxu0 %v1434_v0  ;;  %v1439_v5 = vld [vmem:[%s1991_s1 + $0xf0] sm:$0xff]   ;;  %v1443_v9 = vld [vmem:[%s1991_s1 + $0xe8] sm:$0xff]   ;;  %s1416_s28 = smul.u32 20, %s1997_s27  ;;  %s1276_s27 = sshll.u32 %s1579_s19, 6 }
   0xd   : > { %v1436_v2 = vld [vmem:[%s1991_s1 + $0x38] sm:$0xff]   ;;  %1324 = vmatprep.subr.bf16.mxu1 %v1435_v1  ;;  %v1440_v6 = vld [vmem:[%s1991_s1 + $0x30] sm:$0xff]   ;;  %v1444_v10 = vld [vmem:[%s1991_s1 + $0x28] sm:$0xff]   ;;  %s861_s12 = scalar_lea.vmem [#allocation2], %s1276_s27 }
   0xe   : > { %v1437_v3 = vld [vmem:[%s1991_s1 + $0xb8] sm:$0xff]   ;;  %1285 = vmatpush3.bf16.msra.mxu0 %v1436_v2  ;;  %v1441_v7 = vld [vmem:[%s1991_s1 + $0xb0] sm:$0xff]   ;;  %v1445_v11 = vld [vmem:[%s1991_s1 + $0xa8] sm:$0xff]   ;;  %s1677_s13 = scalar_lea.vmem %s1990_s0, %s1416_s28 }
   0xf   : > { %1325 = vmatpush3.bf16.msra.mxu1 %v1437_v3  ;;  %1286 = vmatprep.subr.bf16.mxu0 %v1438_v4  ;;  %v1446_v12 = vld [vmem:[%s1991_s1 + $0x60] sm:$0xff]   ;;  %v1450_v16 = vld [vmem:[%s1991_s1 + $0x58] sm:$0xff]   ;;  %v1454_v20 = vld [vmem:[%s1991_s1 + $0x50] sm:$0xff]  }
  0x10   : > { %1326 = vmatprep.subr.bf16.mxu1 %v1439_v5  ;;  %v1447_v13 = vld [vmem:[%s1991_s1 + $0xe0] sm:$0xff]   ;;  %v1451_v17 = vld [vmem:[%s1991_s1 + $0xd8] sm:$0xff]   ;;  %v1455_v21 = vld [vmem:[%s1991_s1 + $0xd0] sm:$0xff]  }
  0x11   : > { %v1448_v14 = vld [vmem:[%s1991_s1 + $0x20] sm:$0xff]   ;;  %v1452_v18 = vld [vmem:[%s1991_s1 + $0x18] sm:$0xff]   ;;  %v1456_v22 = vld [vmem:[%s1991_s1 + $0x10] sm:$0xff]  }
  0x12   : > { %1287 = vmatpush3.bf16.msra.mxu0 %v1440_v6  ;;  %v1449_v15 = vld [vmem:[%s1991_s1 + $0xa0] sm:$0xff]   ;;  %v1453_v19 = vld [vmem:[%s1991_s1 + $0x98] sm:$0xff]   ;;  %v1457_v23 = vld [vmem:[%s1991_s1 + $0x90] sm:$0xff]  }
  0x13   : > { %1327 = vmatpush3.bf16.msra.mxu1 %v1441_v7  ;;  %1288 = vmatprep.subr.bf16.mxu0 %v1442_v8  ;;  %v1458_v24 = vld [vmem:[%s1991_s1 + $0x48] sm:$0xff]   ;;  %v1462_v28 = vld [vmem:[%s1991_s1 + $0x40] sm:$0xff]   ;;  %v1472_v36 = vld [vmem:[%s1991_s1 + $0x138] sm:$0xff]  }
  0x14   : > { %1328 = vmatprep.subr.bf16.mxu1 %v1443_v9  ;;  %v1459_v25 = vld [vmem:[%s1991_s1 + $0xc8] sm:$0xff]   ;;  %v1463_v29 = vld [vmem:[%s1991_s1 + $0xc0] sm:$0xff]   ;;  %v1473_v37 = vld [vmem:[%s1991_s1 + $0x130] sm:$0xff]  }
  0x15   : > { %v1460_v26 = vld [vmem:[%s1991_s1 + $0x8] sm:$0xff]   ;;  %v1464_v30 = vld [vmem:[%s1991_s1] sm:$0xff]   ;;  %v1484_v45 = vld [vmem:[%s1677_s13 + $0x5c] ss:$20 sps:$4 sm:$0xff]  }
  0x16   : > { %1289 = vmatpush3.bf16.msra.mxu0 %v1444_v10  ;;  %v1461_v27 = vld [vmem:[%s1991_s1 + $0x88] sm:$0xff]   ;;  %v1465_v31 = vld [vmem:[%s1991_s1 + $0x80] sm:$0xff]   ;;  %v1488_v46 = vld [vmem:[%s1991_s1 + $0x118] sm:$0xff]  }
  0x17   : > { %1329 = vmatpush3.bf16.msra.mxu1 %v1445_v11  ;;  %1290 = vmatprep.subr.bf16.mxu0 %v1446_v12  ;;  %v1466_v32 = vld [vmem:[%s1677_s13] ss:$20 sps:$4 sm:$0xff]   ;;  %v1468_v33 = vld [vmem:[%s1677_s13 + $0x4] ss:$20 sps:$4 sm:$0xff]   ;;  %v1469_v34 = vld [vmem:[%s1677_s13 + $0x8] ss:$20 sps:$4 sm:$0xff]  }
  0x18   : > { %1330 = vmatprep.subr.bf16.mxu1 %v1447_v13  ;;  %v1471_v35 = vld [vmem:[%s1677_s13 + $0xc] ss:$20 sps:$4 sm:$0xff]   ;;  %697 = vmatprep.mubr.bf16.mxu0 %v1468_v33  ;;  %v1476_v39 = vld [vmem:[%s1677_s13 + $0x34] ss:$20 sps:$4 sm:$0xff]   ;;  %v1479_v42 = vld [vmem:[%s1677_s13 + $0x30] ss:$20 sps:$4 sm:$0xff]  }
  0x19   : > { %762 = vmatprep.mubr.bf16.mxu1 %v1471_v35  ;;  %v1474_v38 = vld [vmem:[%s1677_s13 + $0x2c] ss:$20 sps:$4 sm:$0xff]   ;;  %v1478_v40 = vld [vmem:[%s1677_s13 + $0x28] ss:$20 sps:$4 sm:$0xff]   ;;  %v1486_v47 = vld [vmem:[%s1677_s13 + $0x50] ss:$20 sps:$4 sm:$0xff]  }
  0x1a   : > { %1291 = vmatpush3.bf16.msra.mxu0 %v1448_v14  ;;  %v1480_v41 = vld [vmem:[%s1991_s1 + $0x128] sm:$0xff]   ;;  %v1481_v44 = vld [vmem:[%s1991_s1 + $0x120] sm:$0xff]   ;;  %v1490_v49 = vld [vmem:[%s1677_s13 + $0x7c] ss:$20 sps:$4 sm:$0xff]  }
  0x1b   : > { %1331 = vmatpush3.bf16.msra.mxu1 %v1449_v15  ;;  %1292 = vmatprep.subr.bf16.mxu0 %v1450_v16  ;;  %v1482_v43 = vld [vmem:[%s1677_s13 + $0x54] ss:$20 sps:$4 sm:$0xff]   ;;  %v1487_v48 = vld [vmem:[%s1677_s13 + $0x58] ss:$20 sps:$4 sm:$0xff]   ;;  %v1498_v55 = vld [vmem:[%s1677_s13 + $0x10] ss:$20 sps:$4 sm:$0xff]  }
  0x1c   : > { %1332 = vmatprep.subr.bf16.mxu1 %v1451_v17  ;;  %v1492_v50 = vld [vmem:[%s1677_s13 + $0x84] ss:$20 sps:$4 sm:$0xff]   ;;  %v1489_v51 = vld [vmem:[%s1991_s1 + $0x110] sm:$0xff]   ;;  %v1496_v52 = vld [vmem:[%s1991_s1 + $0x108] sm:$0xff]  }
  0x1d   : > { %v1494_v53 = vld [vmem:[%s1677_s13 + $0x78] ss:$20 sps:$4 sm:$0xff]   ;;  %v1495_v54 = vld [vmem:[%s1677_s13 + $0x80] ss:$20 sps:$4 sm:$0xff]   ;;  %v1501_v59 = vld [vmem:[%s1677_s13 + $0x88] ss:$20 sps:$4 sm:$0xff]  }
  0x1e   : > { %1293 = vmatpush3.bf16.msra.mxu0 %v1452_v18  ;;  %v1499_v56 = vld [vmem:[%s1677_s13 + $0x60] ss:$20 sps:$4 sm:$0xff]   ;;  %v1500_v58 = vld [vmem:[%s1677_s13 + $0x38] ss:$20 sps:$4 sm:$0xff]  }
  0x1f   : > { %1333 = vmatpush3.bf16.msra.mxu1 %v1453_v19  ;;  %1294 = vmatprep.subr.bf16.mxu0 %v1454_v20  ;;  %v1497_v57 = vld [vmem:[%s1991_s1 + $0x100] sm:$0xff]  }
  0x20   : > { %1334 = vmatprep.subr.bf16.mxu1 %v1455_v21 }
  0x22   : > { %1295 = vmatpush3.bf16.msra.mxu0 %v1456_v22 }
  0x23   : > { %1335 = vmatpush3.bf16.msra.mxu1 %v1457_v23  ;;  %1296 = vmatprep.subr.bf16.mxu0 %v1458_v24 }
  0x24   : > { %1336 = vmatprep.subr.bf16.mxu1 %v1459_v25 }
  0x26   : > { %1297 = vmatpush3.bf16.msra.mxu0 %v1460_v26 }
  0x27   : > { %1337 = vmatpush3.bf16.msra.mxu1 %v1461_v27  ;;  %1298 = vmatprep.subr.bf16.mxu0 %v1462_v28 }
  0x28   : > { %1338 = vmatprep.subr.bf16.mxu1 %v1463_v29 }
  0x2a   : > { %1299 = vmatpush3.bf16.msra.mxu0 %v1464_v30 }
  0x2b   : > { %1339 = vmatpush3.bf16.msra.mxu1 %v1465_v31  ;;  %1376 = vmatprep.subr.bf16.mxu0 %v1472_v36 }
  0x2c   : > { %1400 = vmatprep.subr.bf16.mxu1 %v1472_v36 }
  0x2d   : > { %698 = vmatmul.mubr.bf16.vlgmr.msra.gmra.mxu0 %v1466_v32 }
  0x2e   : > { %763 = vmatmul.mubr.bf16.vlgmr.msra.gmra.mxu1 %v1469_v34  ;;  %1377 = vmatpush3.bf16.msra.mxu0 %v1472_v36 }
  0x2f   : > { %1408 = vmatpush3.bf16.msra.mxu1 %v1472_v36  ;;  %1378 = vmatprep.subr.bf16.mxu0 %v1473_v37 }
  0x30   : > { %1401 = vmatprep.subr.bf16.mxu1 %v1473_v37  ;;  %705 = vmatprep.mubr.bf16.mxu0 %v1474_v38 }
  0x31   : > { %770 = vmatprep.mubr.bf16.mxu1 %v1476_v39 }
  0x32   : > { %1379 = vmatpush3.bf16.msra.mxu0 %v1473_v37 }
  0x33   : > { %1409 = vmatpush3.bf16.msra.mxu1 %v1473_v37  ;;  %1380 = vmatprep.subr.bf16.mxu0 %v1480_v41 }
  0x34   : > { %1402 = vmatprep.subr.bf16.mxu1 %v1480_v41 }
  0x35   : > { %706 = vmatmul.mubr.bf16.gmra.mxu0 %v1478_v40 }
  0x36   : > { %771 = vmatmul.mubr.bf16.gmra.mxu1 %v1479_v42  ;;  %713 = vmatprep.mubr.bf16.mxu0 %v1482_v43 }
  0x37   : > { %1381 = vmatpush3.bf16.msra.mxu0 %v1480_v41  ;;  %778 = vmatprep.mubr.bf16.mxu1 %v1484_v45 }
  0x38   : > { %1410 = vmatpush3.bf16.msra.mxu1 %v1480_v41  ;;  %1382 = vmatprep.subr.bf16.mxu0 %v1481_v44 }
  0x39   : > { %1403 = vmatprep.subr.bf16.mxu1 %v1481_v44 }
  0x3b   : > { %1383 = vmatpush3.bf16.msra.mxu0 %v1481_v44 }
  0x3c   : > { %1411 = vmatpush3.bf16.msra.mxu1 %v1481_v44  ;;  %1384 = vmatprep.subr.bf16.mxu0 %v1488_v46 }
  0x3d   : > { %714 = vmatmul.mubr.bf16.gmra.mxu0 %v1486_v47  ;;  %1404 = vmatprep.subr.bf16.mxu1 %v1488_v46 }
  0x3e   : > { %779 = vmatmul.mubr.bf16.gmra.mxu1 %v1487_v48  ;;  %721 = vmatprep.mubr.bf16.mxu0 %v1490_v49 }
  0x3f   : > { %1385 = vmatpush3.bf16.msra.mxu0 %v1488_v46  ;;  %786 = vmatprep.mubr.bf16.mxu1 %v1492_v50 }
  0x40   : > { %1412 = vmatpush3.bf16.msra.mxu1 %v1488_v46  ;;  %1386 = vmatprep.subr.bf16.mxu0 %v1489_v51 }
  0x41   : > { %1405 = vmatprep.subr.bf16.mxu1 %v1489_v51 }
  0x43   : > { %1387 = vmatpush3.bf16.msra.mxu0 %v1489_v51 }
  0x44   : > { %1413 = vmatpush3.bf16.msra.mxu1 %v1489_v51  ;;  %1388 = vmatprep.subr.bf16.mxu0 %v1496_v52 }
  0x45   : > { %722 = vmatmul.mubr.bf16.gmra.mxu0 %v1494_v53  ;;  %1406 = vmatprep.subr.bf16.mxu1 %v1496_v52 }
  0x46   : > { %787 = vmatmul.mubr.bf16.gmra.mxu1 %v1495_v54  ;;  %1392 = vmatprep.mubr.bf16.mxu0 %v1498_v55 }
  0x47   : > { %1389 = vmatpush3.bf16.msra.mxu0 %v1496_v52  ;;  %1396 = vmatprep.mubr.bf16.mxu1 %v1499_v56 }
  0x48   : > { %1414 = vmatpush3.bf16.msra.mxu1 %v1496_v52  ;;  %1390 = vmatprep.subr.bf16.mxu0 %v1497_v57 }
  0x49   : > { %1407 = vmatprep.subr.bf16.mxu1 %v1497_v57 }
  0x4b   : > { %1391 = vmatpush3.bf16.msra.mxu0 %v1497_v57 }
  0x4c   : > { %1415 = vmatpush3.bf16.msra.mxu1 %v1497_v57 }
  0x4e   : > { %1393 = vmatmul.mubr.bf16.vlgmr.msra.gmra.mxu0 %v1500_v58 }
  0x4f   : > { %1397 = vmatmul.mubr.bf16.vlgmr.msra.gmra.mxu1 %v1501_v59 }
  0xed   : > { %v1300_v60 = vpop.f32.mrf.mxu0 }
  0xee   : > { %v1340_v61 = vpop.f32.mrf.mxu1 }
  0xef   : > { %v1301_v62 = vpop.f32.mrf.mxu0 }
  0xf0   : > { %v1341_v63 = vpop.f32.mrf.mxu1  ;;  %v1302_v30 = vadd.f32 %v1301_v62, %v1300_v60 }
  0xf1   : > { %v1303_v0 = vpop.f32.mrf.mxu0  ;;  %v1342_v31 = vadd.f32 %v1341_v63, %v1340_v61 }
  0xf2   : > { %v1343_v1 = vpop.f32.mrf.mxu1 }
  0xf3   : > { %v1304_v2 = vpop.f32.mrf.mxu0  ;;  %v765_v47 = vadd.f32 %v1342_v31, %v1302_v30 }
  0xf4   : > { %v1344_v3 = vpop.f32.mrf.mxu1  ;;  %v1305_v43 = vadd.f32 %v1304_v2, %v1303_v0 }
  0xf5   : > { %v1306_v4 = vpop.f32.mrf.mxu0  ;;  %v1345_v44 = vadd.f32 %v1344_v3, %v1343_v1 }
  0xf6   : > { %v1346_v5 = vpop.f32.mrf.mxu1 }
  0xf7   : > { %v1307_v6 = vpop.f32.mrf.mxu0  ;;  %v768_v61 = vadd.f32 %v1345_v44, %v1305_v43 }
  0xf8   : > { %v1347_v7 = vpop.f32.mrf.mxu1  ;;  %v1308_v24 = vadd.f32 %v1307_v6, %v1306_v4 }
  0xf9   : > { %v1309_v8 = vpop.f32.mrf.mxu0  ;;  %v1348_v25 = vadd.f32 %v1347_v7, %v1346_v5 }
  0xfa   : > { %v1349_v9 = vpop.f32.mrf.mxu1 }
  0xfb   : > { %v1310_v10 = vpop.f32.mrf.mxu0  ;;  %v773_v38 = vadd.f32 %v1348_v25, %v1308_v24 }
  0xfc   : > { %v1350_v11 = vpop.f32.mrf.mxu1  ;;  %v1311_v36 = vadd.f32 %v1310_v10, %v1309_v8 }
  0xfd   : > { %v1312_v12 = vpop.f32.mrf.mxu0  ;;  %v1351_v37 = vadd.f32 %v1350_v11, %v1349_v9 }
  0xfe   : > { %v1352_v13 = vpop.f32.mrf.mxu1 }
  0xff   : > { %v1313_v14 = vpop.f32.mrf.mxu0  ;;  %v776_v55 = vadd.f32 %v1351_v37, %v1311_v36 }
 0x100   : > { %v1353_v15 = vpop.f32.mrf.mxu1  ;;  %v1314_v33 = vadd.f32 %v1313_v14, %v1312_v12 }
 0x101   : > { %v1315_v16 = vpop.f32.mrf.mxu0  ;;  %v1354_v34 = vadd.f32 %v1353_v15, %v1352_v13 }
 0x102   : > { %v1355_v17 = vpop.f32.mrf.mxu1 }
 0x103   : > { %v1316_v18 = vpop.f32.mrf.mxu0  ;;  %v781_v52 = vadd.f32 %v1354_v34, %v1314_v33 }
 0x104   : > { %v1356_v19 = vpop.f32.mrf.mxu1  ;;  %v1317_v48 = vadd.f32 %v1316_v18, %v1315_v16 }
 0x105   : > { %v1318_v20 = vpop.f32.mrf.mxu0  ;;  %v1357_v49 = vadd.f32 %v1356_v19, %v1355_v17 }
 0x106   : > { %v1358_v21 = vpop.f32.mrf.mxu1 }
 0x107   : > { %v1319_v22 = vpop.f32.mrf.mxu0  ;;  %v784_v0 = vadd.f32 %v1357_v49, %v1317_v48 }
 0x108   : > { %v1359_v23 = vpop.f32.mrf.mxu1  ;;  %v1320_v27 = vadd.f32 %v1319_v22, %v1318_v20 }
 0x109   : > { %v1321_v26 = vpop.f32.mrf.mxu0  ;;  %v1360_v28 = vadd.f32 %v1359_v23, %v1358_v21 }
 0x10a   : > { %v1361_v29 = vpop.f32.mrf.mxu1 }
 0x10b   : > { %v1322_v32 = vpop.f32.mrf.mxu0  ;;  %v789_v42 = vadd.f32 %v1360_v28, %v1320_v27 }
 0x10c   : > { %v1362_v35 = vpop.f32.mrf.mxu1  ;;  %v1323_v39 = vadd.f32 %v1322_v32, %v1321_v26 }
 0x10d   : > { %v1363_v40 = vadd.f32 %v1362_v35, %v1361_v29 }
 0x10e   : > { %v1394_v41 = vpop.f32.mrf.mxu0 }
 0x10f   : > { %v838_v45 = vadd.f32 %v1394_v41, %v773_v38  ;;  %v1398_v46 = vpop.f32.mrf.mxu1  ;;  %v792_v58 = vadd.f32 %v1363_v40, %v1323_v39 }
 0x110   : > { %v854_v50 = vadd.f32 %v1398_v46, %v789_v42  ;;  %v829_v51 = vpop.f32.mrf.mxu0 }
 0x111   : > { %865 = vst.msk [vmem:[%s861_s12 + $0x10] sm:$0xff] %vm862_vm0, %v838_v45  ;;  %v830_v53 = vadd.f32 %v829_v51, %v765_v47  ;;  %v845_v54 = vpop.f32.mrf.mxu1 }
 0x112   : > { %869 = vst.msk [vmem:[%s861_s12 + $0x30] sm:$0xff] %vm862_vm0, %v854_v50  ;;  %v846_v56 = vadd.f32 %v845_v54, %v781_v52  ;;  %v1395_v57 = vpop.f32.mrf.mxu0 }
 0x113   : > { %863 = vst.msk [vmem:[%s861_s12] sm:$0xff] %vm862_vm0, %v830_v53  ;;  %v841_v59 = vadd.f32 %v1395_v57, %v776_v55  ;;  %v1399_v60 = vpop.f32.mrf.mxu1 }
 0x114   : > { %867 = vst.msk [vmem:[%s861_s12 + $0x20] sm:$0xff] %vm862_vm0, %v846_v56  ;;  %v857_v62 = vadd.f32 %v1399_v60, %v792_v58  ;;  %v832_v63 = vpop.f32.mrf.mxu0  ;;  %874 = sbr.rel (%p1277_p4) target bundleno = 431 (0x1af), region = 44 }
 0x115   : > { %866 = vst.msk [vmem:[%s861_s12 + $0x18] sm:$0xff] %vm862_vm0, %v841_v59  ;;  %v833_v1 = vadd.f32 %v832_v63, %v768_v61  ;;  %v848_v2 = vpop.f32.mrf.mxu1 }
 0x116   : > { %870 = vst.msk [vmem:[%s861_s12 + $0x38] sm:$0xff] %vm862_vm0, %v857_v62  ;;  %v849_v3 = vadd.f32 %v848_v2, %v784_v0 }
 0x117   : > { %864 = vst.msk [vmem:[%s861_s12 + $0x8] sm:$0xff] %vm862_vm0, %v833_v1 }
 0x118   : > { %868 = vst.msk [vmem:[%s861_s12 + $0x28] sm:$0xff] %vm862_vm0, %v849_v3 }
 0x11f   : > { %v875_v4 = vld [vmem:[#allocation2] sm:$0xff]  ;;  %v876_v5 = vld [vmem:[#allocation2 + $0x8] sm:$0xff]  ;;  %v877_v6 = vld [vmem:[#allocation2 + $0x10] sm:$0xff] }
 0x120   : > { %v878_v7 = vld [vmem:[#allocation2 + $0x18] sm:$0xff]  ;;  %v891_v8 = vsel %vm862_vm0, %v875_v4, 0.0  ;;  %v892_v9 = vsel %vm862_vm0, %v876_v5, 0.0  ;;  %v894_v10 = vsel %vm862_vm0, %v877_v6, 0.0  ;;  %v879_v11 = vld [vmem:[#allocation2 + $0x20] sm:$0xff]  ;;  %v880_v14 = vld [vmem:[#allocation2 + $0x28] sm:$0xff] }
 0x121   : > { %v893_v12 = vadd.f32 %v892_v9, %v891_v8  ;;  %v896_v13 = vsel %vm862_vm0, %v878_v7, 0.0  ;;  %v898_v16 = vsel %vm862_vm0, %v879_v11, 0.0  ;;  %v881_v17 = vld [vmem:[#allocation2 + $0x30] sm:$0xff]  ;;  %v900_v19 = vsel %vm862_vm0, %v880_v14, 0.0  ;;  %v882_v20 = vld [vmem:[#allocation2 + $0x38] sm:$0xff]  ;;  %v883_v23 = vld [vmem:[#allocation2 + $0x40] sm:$0xff] }
 0x122   : > { %v902_v22 = vsel %vm862_vm0, %v881_v17, 0.0  ;;  %v904_v25 = vsel %vm862_vm0, %v882_v20, 0.0  ;;  %v884_v26 = vld [vmem:[#allocation2 + $0x48] sm:$0xff]  ;;  %v906_v28 = vsel %vm862_vm0, %v883_v23, 0.0  ;;  %v885_v29 = vld [vmem:[#allocation2 + $0x50] sm:$0xff]  ;;  %v886_v32 = vld [vmem:[#allocation2 + $0x58] sm:$0xff] }
 0x123   : > { %v895_v15 = vadd.f32 %v894_v10, %v893_v12  ;;  %v908_v31 = vsel %vm862_vm0, %v884_v26, 0.0  ;;  %v910_v34 = vsel %vm862_vm0, %v885_v29, 0.0  ;;  %v887_v35 = vld [vmem:[#allocation2 + $0x60] sm:$0xff]  ;;  %v912_v37 = vsel %vm862_vm0, %v886_v32, 0.0  ;;  %v888_v38 = vld [vmem:[#allocation2 + $0x68] sm:$0xff]  ;;  %v889_v41 = vld [vmem:[#allocation2 + $0x70] sm:$0xff] }
 0x124   : > { %v914_v40 = vsel %vm862_vm0, %v887_v35, 0.0  ;;  %v916_v43 = vsel %vm862_vm0, %v888_v38, 0.0  ;;  %v890_v44 = vld [vmem:[#allocation2 + $0x78] sm:$0xff]  ;;  %v918_v46 = vsel %vm862_vm0, %v889_v41, 0.0 }
 0x125   : > { %v897_v18 = vadd.f32 %v896_v13, %v895_v15  ;;  %v920_v48 = vsel %vm862_vm0, %v890_v44, 0.0 }
 0x127   : > { %v899_v21 = vadd.f32 %v898_v16, %v897_v18 }
 0x129   : > { %v901_v24 = vadd.f32 %v900_v19, %v899_v21 }
 0x12b   : > { %v903_v27 = vadd.f32 %v902_v22, %v901_v24 }
 0x12d   : > { %v905_v30 = vadd.f32 %v904_v25, %v903_v27 }
 0x12f   : > { %v907_v33 = vadd.f32 %v906_v28, %v905_v30 }
 0x131   : > { %v909_v36 = vadd.f32 %v908_v31, %v907_v33 }
 0x133   : > { %v911_v39 = vadd.f32 %v910_v34, %v909_v36 }
 0x135   : > { %v913_v42 = vadd.f32 %v912_v37, %v911_v39 }
 0x137   : > { %v915_v45 = vadd.f32 %v914_v40, %v913_v42 }
 0x139   : > { %v917_v47 = vadd.f32 %v916_v43, %v915_v45 }
 0x13b   : > { %v919_v49 = vadd.f32 %v918_v46, %v917_v47 }
 0x13d   : > { %v921_v50 = vadd.f32 %v920_v48, %v919_v49 }
 0x13f   : > { %v922_v51 = vrot.slane %v921_v50, 4 }
 0x141   : > { %v923_v52 = vadd.f32 %v922_v51, %v921_v50 }
 0x143   : > { %v924_v53 = vrot.slane %v923_v52, 2 }
 0x145   : > { %v925_v54 = vadd.f32 %v924_v53, %v923_v52 }
 0x147   : > { %v926_v55 = vrot.slane %v925_v54, 1 }
 0x149   : > { %v927_v56 = vadd.f32 %v926_v55, %v925_v54 }
 0x14b   : > { %v929_v57 = vmul.f32 0.0078125, %v927_v56 }
 0x14d   : > { %v1755_v58 = vsub.f32 %v875_v4, %v929_v57  ;;  %v1757_v59 = vsub.f32 %v876_v5, %v929_v57  ;;  %v1759_v60 = vsub.f32 %v877_v6, %v929_v57  ;;  %v1761_v61 = vsub.f32 %v878_v7, %v929_v57 }
 0x14e   : > { %v1763_v62 = vsub.f32 %v879_v11, %v929_v57  ;;  %v1771_v2 = vsub.f32 %v880_v14, %v929_v57  ;;  %v1775_v4 = vsub.f32 %v881_v17, %v929_v57  ;;  %v1782_v10 = vsub.f32 %v882_v20, %v929_v57 }
 0x14f   : > { %v946_v63 = vmul.f32 %v1755_v58, %v1755_v58  ;;  %v947_v0 = vmul.f32 %v1757_v59, %v1757_v59  ;;  %v948_v1 = vmul.f32 %v1759_v60, %v1759_v60  ;;  %v949_v3 = vmul.f32 %v1761_v61, %v1761_v61 }
 0x150   : > { %v950_v5 = vmul.f32 %v1763_v62, %v1763_v62  ;;  %v951_v11 = vmul.f32 %v1771_v2, %v1771_v2  ;;  %v1787_v14 = vsub.f32 %v883_v23, %v929_v57  ;;  %v952_v15 = vmul.f32 %v1775_v4, %v1775_v4 }
 0x151   : > { %v962_v6 = vsel %vm862_vm0, %v946_v63, 0.0  ;;  %v963_v7 = vsel %vm862_vm0, %v947_v0, 0.0  ;;  %v965_v8 = vsel %vm862_vm0, %v948_v1, 0.0  ;;  %v967_v12 = vsel %vm862_vm0, %v949_v3, 0.0 }
 0x152   : > { %v964_v9 = vadd.f32 %v963_v7, %v962_v6  ;;  %v969_v16 = vsel %vm862_vm0, %v950_v5, 0.0  ;;  %v1792_v18 = vsub.f32 %v884_v26, %v929_v57  ;;  %v953_v19 = vmul.f32 %v1782_v10, %v1782_v10 }
 0x153   : > { %v971_v20 = vsel %vm862_vm0, %v951_v11, 0.0  ;;  %v1797_v22 = vsub.f32 %v885_v29, %v929_v57  ;;  %v954_v23 = vmul.f32 %v1787_v14, %v1787_v14  ;;  %v973_v24 = vsel %vm862_vm0, %v952_v15, 0.0 }
 0x154   : > { %v966_v13 = vadd.f32 %v965_v8, %v964_v9  ;;  %v1802_v27 = vsub.f32 %v886_v32, %v929_v57  ;;  %v955_v26 = vmul.f32 %v1792_v18, %v1792_v18  ;;  %v975_v28 = vsel %vm862_vm0, %v953_v19, 0.0  ;;  %v1840_v9 = vld [vmem:[%s1992_s2] ss:$0 sm:$0xff] }
 0x155   : > { %v1807_v31 = vsub.f32 %v887_v35, %v929_v57  ;;  %v956_v29 = vmul.f32 %v1797_v22, %v1797_v22  ;;  %v977_v33 = vsel %vm862_vm0, %v954_v23, 0.0  ;;  %v1812_v36 = vsub.f32 %v888_v38, %v929_v57 }
 0x156   : > { %v968_v17 = vadd.f32 %v967_v12, %v966_v13  ;;  %v957_v32 = vmul.f32 %v1802_v27, %v1802_v27  ;;  %v979_v37 = vsel %vm862_vm0, %v955_v26, 0.0  ;;  %v1817_v40 = vsub.f32 %v889_v41, %v929_v57 }
 0x157   : > { %v958_v35 = vmul.f32 %v1807_v31, %v1807_v31  ;;  %v981_v42 = vsel %vm862_vm0, %v956_v29, 0.0  ;;  %v1822_v45 = vsub.f32 %v890_v44, %v929_v57  ;;  %v959_v38 = vmul.f32 %v1812_v36, %v1812_v36 }
 0x158   : > { %v970_v21 = vadd.f32 %v969_v16, %v968_v17  ;;  %v983_v46 = vsel %vm862_vm0, %v957_v32, 0.0  ;;  %v960_v48 = vmul.f32 %v1817_v40, %v1817_v40  ;;  %v1853_v16 = vld [vmem:[%s1993_s3] ss:$0 sm:$0xff]  ;;  %v1069_v32 = vld [vmem:[%s1994_s4 + $0x28] sm:$0xff] }
 0x159   : > { %v985_v41 = vsel %vm862_vm0, %v958_v35, 0.0  ;;  %v961_v50 = vmul.f32 %v1822_v45, %v1822_v45  ;;  %v987_v51 = vsel %vm862_vm0, %v959_v38, 0.0 }
 0x15a   : > { %v972_v25 = vadd.f32 %v971_v20, %v970_v21  ;;  %v989_v44 = vsel %vm862_vm0, %v960_v48, 0.0 }
 0x15b   : > { %v991_v54 = vsel %vm862_vm0, %v961_v50, 0.0 }
 0x15c   : > { %v974_v30 = vadd.f32 %v973_v24, %v972_v25  ;;  %v1068_v24 = vld [vmem:[%s1994_s4 + $0x20] sm:$0xff] }
 0x15e   : > { %v976_v34 = vadd.f32 %v975_v28, %v974_v30 }
 0x160   : > { %v978_v39 = vadd.f32 %v977_v33, %v976_v34 }
 0x162   : > { %v980_v43 = vadd.f32 %v979_v37, %v978_v39  ;;  %v1070_v37 = vld [vmem:[%s1994_s4 + $0x30] sm:$0xff]  ;;  %v1071_v39 = vld [vmem:[%s1994_s4 + $0x38] sm:$0xff] }
 0x164   : > { %v982_v47 = vadd.f32 %v981_v42, %v980_v43 }
 0x166   : > { %v984_v49 = vadd.f32 %v983_v46, %v982_v47 }
 0x168   : > { %v986_v52 = vadd.f32 %v985_v41, %v984_v49 }
 0x16a   : > { %v988_v53 = vadd.f32 %v987_v51, %v986_v52 }
 0x16c   : > { %v990_v55 = vadd.f32 %v989_v44, %v988_v53 }
 0x16e   : > { %v992_v56 = vadd.f32 %v991_v54, %v990_v55 }
 0x170   : > { %v993_v57 = vrot.slane %v992_v56, 4 }
 0x172   : > { %v994_v63 = vadd.f32 %v993_v57, %v992_v56 }
 0x174   : > { %v995_v0 = vrot.slane %v994_v63, 2 }
 0x176   : > { %v996_v1 = vadd.f32 %v995_v0, %v994_v63 }
 0x178   : > { %v997_v3 = vrot.slane %v996_v1, 1 }
 0x17a   : > { %v998_v5 = vadd.f32 %v997_v3, %v996_v1 }
 0x17c   : > { %v999_v6 = vmul.f32 0.0078125, %v998_v5 }
 0x17e   : > { %v1000_v7 = vadd.f32 1e-05, %v999_v6 }
 0x180   : > { %1502 = vrsqrt.f32 %v1000_v7 }
 0x18d   : > { %v1835_v8 = vpop.eup %1502 }
 0x18e   : > { %v1002_v11 = vmul.f32 %v1835_v8, %v1755_v58  ;;  %v1003_v12 = vmul.f32 %v1835_v8, %v1757_v59  ;;  %v1004_v13 = vmul.f32 %v1835_v8, %v1759_v60  ;;  %v1005_v15 = vmul.f32 %v1835_v8, %v1761_v61  ;;  %v1064_v61 = vld [vmem:[%s1994_s4] sm:$0xff] }
 0x18f   : > { %v1006_v17 = vmul.f32 %v1835_v8, %v1763_v62  ;;  %v1007_v58 = vmul.f32 %v1835_v8, %v1771_v2  ;;  %v1008_v59 = vmul.f32 %v1835_v8, %v1775_v4  ;;  %v1009_v60 = vmul.f32 %v1835_v8, %v1782_v10  ;;  %v1065_v62 = vld [vmem:[%s1994_s4 + $0x8] sm:$0xff]  ;;  %v1066_v4 = vld [vmem:[%s1994_s4 + $0x10] sm:$0xff]  ;;  %v1067_v10 = vld [vmem:[%s1994_s4 + $0x18] sm:$0xff] }
 0x190   : > { %v1025_v19 = vmul.f32 %v1840_v9, %v1002_v11  ;;  %v1026_v20 = vmul.f32 %v1840_v9, %v1003_v12  ;;  %v1027_v2 = vmul.f32 %v1840_v9, %v1004_v13  ;;  %v1028_v21 = vmul.f32 %v1840_v9, %v1005_v15 }
 0x191   : > { %v1029_v23 = vmul.f32 %v1840_v9, %v1006_v17  ;;  %v1030_v25 = vmul.f32 %v1840_v9, %v1007_v58  ;;  %v1031_v26 = vmul.f32 %v1840_v9, %v1008_v59  ;;  %v1032_v28 = vmul.f32 %v1840_v9, %v1009_v60 }
 0x192   : > { %v1048_v30 = vadd.f32 %v1853_v16, %v1025_v19  ;;  %v1049_v29 = vadd.f32 %v1853_v16, %v1026_v20  ;;  %v1050_v33 = vadd.f32 %v1853_v16, %v1027_v2  ;;  %v1051_v34 = vadd.f32 %v1853_v16, %v1028_v21  ;;  %v1074_v21 = vld [vmem:[%s1994_s4 + $0x50] sm:$0xff] }
 0x193   : > { %v1052_v35 = vadd.f32 %v1853_v16, %v1029_v23  ;;  %v1053_v42 = vadd.f32 %v1853_v16, %v1030_v25  ;;  %v1054_v43 = vadd.f32 %v1853_v16, %v1031_v26  ;;  %v1055_v38 = vadd.f32 %v1853_v16, %v1032_v28 }
 0x194   : > { %v1080_v46 = vadd.f32 %v1064_v61, %v1048_v30  ;;  %v1081_v47 = vadd.f32 %v1065_v62, %v1049_v29  ;;  %v1082_v48 = vadd.f32 %v1066_v4, %v1050_v33  ;;  %v1083_v41 = vadd.f32 %v1067_v10, %v1051_v34  ;;  %v1075_v4 = vld [vmem:[%s1994_s4 + $0x58] sm:$0xff]  ;;  %v1076_v10 = vld [vmem:[%s1994_s4 + $0x60] sm:$0xff] }
 0x195   : > { %v1084_v49 = vadd.f32 %v1068_v24, %v1052_v35  ;;  %v1085_v50 = vadd.f32 %v1069_v32, %v1053_v42  ;;  %v1086_v51 = vadd.f32 %v1070_v37, %v1054_v43  ;;  %v1087_v52 = vadd.f32 %v1071_v39, %v1055_v38  ;;  %v1078_v35 = vld [vmem:[%s1994_s4 + $0x70] sm:$0xff] }
 0x196   : > { %vm1096_vm1 = vcmp.ge.f32.partialorder %v1080_v46, 0.0  ;;  %v1112_v44 = vmul.f32 0.01, %v1080_v46  ;;  %vm1097_vm2 = vcmp.ge.f32.partialorder %v1081_v47, 0.0  ;;  %v1113_v53 = vmul.f32 0.01, %v1081_v47 }
 0x197   : > { %vm1098_vm3 = vcmp.ge.f32.partialorder %v1082_v48, 0.0  ;;  %v1114_v54 = vmul.f32 0.01, %v1082_v48  ;;  %vm1099_vm4 = vcmp.ge.f32.partialorder %v1083_v41, 0.0  ;;  %v1115_v55 = vmul.f32 0.01, %v1083_v41 }
 0x198   : > { %v1128_v56 = vsel %vm1096_vm1, %v1080_v46, %v1112_v44  ;;  %v1129_v57 = vsel %vm1097_vm2, %v1081_v47, %v1113_v53  ;;  %vm1100_vm5 = vcmp.ge.f32.partialorder %v1084_v49, 0.0  ;;  %v1116_v63 = vmul.f32 0.01, %v1084_v49 }
 0x199   : > { %1144 = vst.msk [vmem:[#allocation2] sm:$0xff] %vm862_vm0, %v1128_v56  ;;  %1145 = vst.msk [vmem:[#allocation2 + $0x8] sm:$0xff] %vm862_vm0, %v1129_v57  ;;  %v1130_v0 = vsel %vm1098_vm3, %v1082_v48, %v1114_v54  ;;  %v1131_v1 = vsel %vm1099_vm4, %v1083_v41, %v1115_v55  ;;  %vm1101_vm6 = vcmp.ge.f32.partialorder %v1085_v50, 0.0  ;;  %v1117_v3 = vmul.f32 0.01, %v1085_v50 }
 0x19a   : > { %1146 = vst.msk [vmem:[#allocation2 + $0x10] sm:$0xff] %vm862_vm0, %v1130_v0  ;;  %1147 = vst.msk [vmem:[#allocation2 + $0x18] sm:$0xff] %vm862_vm0, %v1131_v1  ;;  %v1132_v5 = vsel %vm1100_vm5, %v1084_v49, %v1116_v63  ;;  %vm1102_vm7 = vcmp.ge.f32.partialorder %v1086_v51, 0.0  ;;  %v1118_v6 = vmul.f32 0.01, %v1086_v51  ;;  %vm1103_vm8 = vcmp.ge.f32.partialorder %v1087_v52, 0.0 }
 0x19b   : > { %1148 = vst.msk [vmem:[#allocation2 + $0x20] sm:$0xff] %vm862_vm0, %v1132_v5  ;;  %v1133_v7 = vsel %vm1101_vm6, %v1085_v50, %v1117_v3  ;;  %v1119_v11 = vmul.f32 0.01, %v1087_v52  ;;  %v1010_v12 = vmul.f32 %v1835_v8, %v1787_v14  ;;  %v1011_v13 = vmul.f32 %v1835_v8, %v1792_v18 }
 0x19c   : > { %1149 = vst.msk [vmem:[#allocation2 + $0x28] sm:$0xff] %vm862_vm0, %v1133_v7  ;;  %v1134_v15 = vsel %vm1102_vm7, %v1086_v51, %v1118_v6  ;;  %v1012_v17 = vmul.f32 %v1835_v8, %v1797_v22  ;;  %v1013_v58 = vmul.f32 %v1835_v8, %v1802_v27  ;;  %v1014_v59 = vmul.f32 %v1835_v8, %v1807_v31  ;;  %v1072_v22 = vld [vmem:[%s1994_s4 + $0x40] sm:$0xff]  ;;  %v1073_v27 = vld [vmem:[%s1994_s4 + $0x48] sm:$0xff] }
 0x19d   : > { %1150 = vst.msk [vmem:[#allocation2 + $0x30] sm:$0xff] %vm862_vm0, %v1134_v15  ;;  %v1135_v60 = vsel %vm1103_vm8, %v1087_v52, %v1119_v11  ;;  %v1033_v14 = vmul.f32 %v1840_v9, %v1010_v12  ;;  %v1034_v19 = vmul.f32 %v1840_v9, %v1011_v13  ;;  %v1015_v18 = vmul.f32 %v1835_v8, %v1812_v36  ;;  %v1079_v52 = vld [vmem:[%s1994_s4 + $0x78] sm:$0xff] }
 0x19e   : > { %1151 = vst.msk [vmem:[#allocation2 + $0x38] sm:$0xff] %vm862_vm0, %v1135_v60  ;;  %v1035_v31 = vmul.f32 %v1840_v9, %v1012_v17  ;;  %v1036_v61 = vmul.f32 %v1840_v9, %v1013_v58  ;;  %v1037_v20 = vmul.f32 %v1840_v9, %v1014_v59  ;;  %v1016_v62 = vmul.f32 %v1835_v8, %v1817_v40 }
 0x19f   : > { %v1056_v36 = vadd.f32 %v1853_v16, %v1033_v14  ;;  %v1057_v2 = vadd.f32 %v1853_v16, %v1034_v19  ;;  %v1038_v23 = vmul.f32 %v1840_v9, %v1015_v18  ;;  %v1017_v40 = vmul.f32 %v1835_v8, %v1822_v45  ;;  %v1077_v45 = vld [vmem:[%s1994_s4 + $0x68] sm:$0xff] }
 0x1a0   : > { %v1058_v24 = vadd.f32 %v1853_v16, %v1035_v31  ;;  %v1059_v25 = vadd.f32 %v1853_v16, %v1036_v61  ;;  %v1060_v26 = vadd.f32 %v1853_v16, %v1037_v20  ;;  %v1039_v28 = vmul.f32 %v1840_v9, %v1016_v62 }
 0x1a1   : > { %v1088_v30 = vadd.f32 %v1072_v22, %v1056_v36  ;;  %v1089_v29 = vadd.f32 %v1073_v27, %v1057_v2  ;;  %v1061_v33 = vadd.f32 %v1853_v16, %v1038_v23  ;;  %v1040_v34 = vmul.f32 %v1840_v9, %v1017_v40 }
 0x1a2   : > { %v1090_v32 = vadd.f32 %v1074_v21, %v1058_v24  ;;  %v1091_v37 = vadd.f32 %v1075_v4, %v1059_v25  ;;  %v1092_v39 = vadd.f32 %v1076_v10, %v1060_v26  ;;  %v1062_v8 = vadd.f32 %v1853_v16, %v1039_v28 }
 0x1a3   : > { %vm1104_vm9 = vcmp.ge.f32.partialorder %v1088_v30, 0.0  ;;  %v1120_v42 = vmul.f32 0.01, %v1088_v30  ;;  %vm1105_vm10 = vcmp.ge.f32.partialorder %v1089_v29, 0.0  ;;  %v1121_v43 = vmul.f32 0.01, %v1089_v29 }
 0x1a4   : > { %vm1106_vm11 = vcmp.ge.f32.partialorder %v1090_v32, 0.0  ;;  %v1122_v38 = vmul.f32 0.01, %v1090_v32  ;;  %vm1107_vm12 = vcmp.ge.f32.partialorder %v1091_v37, 0.0  ;;  %v1123_v9 = vmul.f32 0.01, %v1091_v37 }
 0x1a5   : > { %v1136_v46 = vsel %vm1104_vm9, %v1088_v30, %v1120_v42  ;;  %v1137_v47 = vsel %vm1105_vm10, %v1089_v29, %v1121_v43  ;;  %vm1108_vm13 = vcmp.ge.f32.partialorder %v1092_v39, 0.0  ;;  %v1124_v48 = vmul.f32 0.01, %v1092_v39 }
 0x1a6   : > { %1152 = vst.msk [vmem:[#allocation2 + $0x40] sm:$0xff] %vm862_vm0, %v1136_v46  ;;  %1153 = vst.msk [vmem:[#allocation2 + $0x48] sm:$0xff] %vm862_vm0, %v1137_v47  ;;  %v1138_v41 = vsel %vm1106_vm11, %v1090_v32, %v1122_v38  ;;  %v1139_v49 = vsel %vm1107_vm12, %v1091_v37, %v1123_v9  ;;  %v1093_v50 = vadd.f32 %v1077_v45, %v1061_v33 }
 0x1a7   : > { %v1094_v51 = vadd.f32 %v1078_v35, %v1062_v8  ;;  %1154 = vst.msk [vmem:[#allocation2 + $0x50] sm:$0xff] %vm862_vm0, %v1138_v41  ;;  %1155 = vst.msk [vmem:[#allocation2 + $0x58] sm:$0xff] %vm862_vm0, %v1139_v49  ;;  %v1140_v44 = vsel %vm1108_vm13, %v1092_v39, %v1124_v48  ;;  %v1063_v53 = vadd.f32 %v1853_v16, %v1040_v34 }
 0x1a8   : > { %1156 = vst.msk [vmem:[#allocation2 + $0x60] sm:$0xff] %vm862_vm0, %v1140_v44  ;;  %vm1109_vm14 = vcmp.ge.f32.partialorder %v1093_v50, 0.0  ;;  %v1125_v54 = vmul.f32 0.01, %v1093_v50 }
 0x1a9   : > { %vm1110_vm15 = vcmp.ge.f32.partialorder %v1094_v51, 0.0  ;;  %v1126_v55 = vmul.f32 0.01, %v1094_v51  ;;  %v1095_v56 = vadd.f32 %v1079_v52, %v1063_v53 }
 0x1aa   : > { %v1141_v57 = vsel %vm1109_vm14, %v1093_v50, %v1125_v54 }
 0x1ab   : > { %v1142_v63 = vsel %vm1110_vm15, %v1094_v51, %v1126_v55  ;;  %1157 = vst.msk [vmem:[#allocation2 + $0x68] sm:$0xff] %vm862_vm0, %v1141_v57  ;;  %vm1111_vm1 = vcmp.ge.f32.partialorder %v1095_v56, 0.0  ;;  %v1127_v0 = vmul.f32 0.01, %v1095_v56 }
 0x1ac   : > { %1158 = vst.msk [vmem:[#allocation2 + $0x70] sm:$0xff] %vm862_vm0, %v1142_v63 }
 0x1ad   : > { %v1143_v1 = vsel %vm1111_vm1, %v1095_v56, %v1127_v0 }
 0x1ae   : > { %1159 = vst.msk [vmem:[#allocation2 + $0x78] sm:$0xff] %vm862_vm0, %v1143_v1 }
 0x1af PF: > { %p1421_p5 = scmp.eq.s32.totalorder %s1579_s19, 1  ;;  %s1540_s29 = smov [#allocation2]  }
 0x1b0   : > { %s1166_s30 = sshll.u32 %s1540_s29, 4  ;;  %s1167_s30 = int_to_ptr.vmem [resolvable:$true] %s1166_s30 }
 0x1b1   : > { %s1504_s6 = scalar_lea.vmem %s1167_s30, 2048  ;;  %p1511_p9 = scmp.lt.s32.totalorder %s1167_s30, %s1167_s30 }
 0x1b2   : > { %p1505_p6 = scmp.ne.s32.totalorder %s1167_s30, %s1504_s6  ;;  %p1512_p10 = scmp.lt.s32.totalorder %s1504_s6, %s1504_s6 }
 0x1b4   : > { %p1506_p7 = pnand %p1505_p6, %p1421_p5  ;;  %p1513_p11 = por %p1512_p10, %p1511_p9 }
 0x1b6   : > { %p1507_p8 = pneg %p1506_p7 }
 0x1b8   : > { %p1514_p12 = pnand %p1513_p11, %p1507_p8 }
 0x1ba   : > { %1517 = shalt.err (!%p1514_p12)
}
 0x1bb   : > { %s1541_s7 = smov 128   ;;  %s1542_s8 = smov 8  }
 0x1bc   : > { %1418 = dma.vmem_to_hbm [thread:$0]  (%p1421_p5), %s1167_s30, 2048, %s1995_s5, [#allocation3], %s1541_s7, %s1541_s7, %s1542_s8  }
 0x1bd   : > { %1533 = dma.done.wait (%p1421_p5), [#allocation3], 2048  }
 0x1be   : > { %1535 = vsyncadd (%p1421_p5), [#allocation3], 4294965248 }
 0x1bf PF: > { %s16_s18 = sadd.s32 1, %s1538_s18  }
 0x1c0   : > { %p13_p13 = scmp.ge.s32.totalorder %s16_s18, 4  }
 0x1c2   :  { %15 = sbr.rel (!%p13_p13) target bundleno = 1 (0x1), region = 72 }
 0x1c7   :  { %1182 = vsyncpa [#allocation3], 1 }
 0x1c8   :  { %1184 = vsyncpa [#allocation3 + $0x1], 1 }

</bundles_post_ra>
